<compile_context>
chip_gen: v5e
topology: v5e:2x2
jax: 0.10.0
libtpu: 0.0.40
codegen_flags: <defaults>
</compile_context>

<pallas_src>
import functools

import jax
import jax.numpy as jnp
from jax.experimental import pallas as pl
from jax.experimental.pallas import tpu as pltpu


def _round_up(x, m):
    return ((x + m - 1) // m) * m


def _vmem_capacity_bytes():
    try:
        return int(pltpu.get_tpu_info().vmem_capacity_bytes)
    except Exception:
        return 64 * 1024 * 1024      # conservative default (v7x-sized VMEM)


def _choose_row_tile(n_pad, adj_itemsize, batch, n_real, vmem_cap):
    """Node-row tile TN: 128-aligned (>=64), generation-aware, VMEM-budgeted."""
    big_vmem = vmem_cap >= 100 * 1024 * 1024           # v5e / v6e (128 MiB VMEM)
    tn = 512 if big_vmem else 256
    adj_budget = (24 if big_vmem else 8) * 1024 * 1024
    # Shrink until TN divides n_pad and the double-buffered adj tile fits budget.
    while tn > 128 and (n_pad % tn or 2 * tn * n_pad * adj_itemsize > adj_budget):
        tn //= 2
    # Keep >= 2 grid points (both v7x TensorCores busy) when the graph allows it.
    while batch * (n_pad // tn) < 2 and tn > 64 and n_real > tn // 2:
        tn //= 2
    return tn


def graphconv_kernel(adj_ref, xk_ref,
                     w1_ref, b1_ref, w2_ref, b2_ref,
                     w3_ref, b3_ref, w4_ref, b4_ref,
                     o_ref, *, row_tile):
    # adj_ref: (1, TN, Np) input dtype    xk_ref: (1, Np, Cp) bf16
    # weights: (Cp, Cp) bf16              biases: (1, Cp) f32
    adj = adj_ref[0]
    if adj.dtype != jnp.bfloat16:
        adj = adj.astype(jnp.bfloat16)   # per-tile cast; kernel is adj-BW-bound

    # Message passing on the MXU with f32 accumulation.
    h = jnp.dot(adj, xk_ref[0], preferred_element_type=jnp.float32)  # (TN, Cp)

    def mlp(t, w_a, b_a, w_b, b_b):
        t = jnp.dot(t.astype(jnp.bfloat16), w_a[...],
                    preferred_element_type=jnp.float32) + b_a[...]
        t = jnp.maximum(t, 0.0)
        t = jnp.dot(t.astype(jnp.bfloat16), w_b[...],
                    preferred_element_type=jnp.float32) + b_b[...]
        return jnp.maximum(t, 0.0)

    h = mlp(h, w1_ref, b1_ref, w2_ref, b2_ref)          # lin1

    # Residual from the already-resident x block (no dedicated x0 stream).
    r0 = pl.multiple_of(pl.program_id(1) * row_tile, row_tile)
    x0 = xk_ref[0, pl.ds(r0, row_tile), :]
    z = x0.astype(jnp.float32) + h
    z = mlp(z, w3_ref, b3_ref, w4_ref, b4_ref)          # lin2
    o_ref[0] = z.astype(o_ref.dtype)


_SINGLE_BUFFER_OK = None     # resolved by a one-time capability probe


def _build_call(kernel, batch, n_tiles, tn, n_pad, c_pad, out_dtype,
                vmem_limit, cost, single_buffer_invariants):
    def inv_spec(shape, index_map):
        if single_buffer_invariants:
            # Block index is constant along the inner grid axis -> one buffer.
            return pl.BlockSpec(shape, index_map,
                                pipeline_mode=pl.Buffered(buffer_count=1))
        return pl.BlockSpec(shape, index_map)

    w_spec = inv_spec((c_pad, c_pad), lambda b, i: (0, 0))
    b_spec = inv_spec((1, c_pad), lambda b, i: (0, 0))
    return pl.pallas_call(
        kernel,
        out_shape=jax.ShapeDtypeStruct((batch, n_pad, c_pad), out_dtype),
        grid_spec=pltpu.PrefetchScalarGridSpec(
            num_scalar_prefetch=0,
            grid=(batch, n_tiles),
            in_specs=[
                pl.BlockSpec((1, tn, n_pad), lambda b, i: (b, i, 0)),   # adj rows
                inv_spec((1, n_pad, c_pad), lambda b, i: (b, 0, 0)),    # x (resident)
                w_spec, b_spec,   # lin1 layer 1
                w_spec, b_spec,   # lin1 layer 2
                w_spec, b_spec,   # lin2 layer 1
                w_spec, b_spec,   # lin2 layer 2
            ],
            out_specs=pl.BlockSpec((1, tn, c_pad), lambda b, i: (b, i, 0)),
        ),
        compiler_params=pltpu.CompilerParams(
            dimension_semantics=("parallel", "parallel"),
            vmem_limit_bytes=vmem_limit),
        cost_estimate=cost,
    )


def graphconv(x, adj, params, *, row_tile=None):
    """x: (B, N, C), adj: (B, N, N) (f32 or bf16), params: dict of (in,out) mats."""
    global _SINGLE_BUFFER_OK
    B, N, C = x.shape
    assert adj.shape == (B, N, N)

    c_pad = _round_up(max(C, 128), 128)        # lane-dense channels
    n_pad = _round_up(N, 128)                  # lane-dense adj contraction dim
    vmem_cap = _vmem_capacity_bytes()
    if row_tile is None:
        tn = _choose_row_tile(n_pad, adj.dtype.itemsize, B, N, vmem_cap)
    else:
        tn = row_tile
        if n_pad % tn:
            raise ValueError(f"row_tile={tn} must divide padded node count {n_pad}")
    n_tiles = n_pad // tn

    # Pad only when needed.  adj keeps its input dtype (cast happens per-tile
    # inside the kernel); x is N/C-times smaller, so a single bf16 cast here
    # is cheap and keeps its resident VMEM block at 2 B/elem.
    adj_p = adj if n_pad == N else jnp.pad(
        adj, ((0, 0), (0, n_pad - N), (0, n_pad - N)))
    x_b = x.astype(jnp.bfloat16)
    if n_pad != N or c_pad != C:
        x_b = jnp.pad(x_b, ((0, 0), (0, n_pad - N), (0, c_pad - C)))

    def pad_w(w):
        return jnp.pad(w, ((0, c_pad - C), (0, c_pad - C))).astype(jnp.bfloat16)

    def pad_b(b):
        return jnp.pad(b, ((0, 0), (0, c_pad - C))).astype(jnp.float32)

    w1, w2, w3, w4 = (pad_w(params[k]) for k in ("w1", "w2", "w3", "w4"))
    b1, b2, b3, b4 = (pad_b(params[k]) for k in ("b1", "b2", "b3", "b4"))

    # VMEM footprint -> explicit limit with >= 8 MiB compiler-scratch headroom.
    adj_bytes = 2 * tn * n_pad * adj_p.dtype.itemsize        # double-buffered
    x_bytes = 2 * n_pad * c_pad * 2                          # conservative (2 bufs)
    out_bytes = 2 * tn * c_pad * x.dtype.itemsize
    w_bytes = 2 * (4 * c_pad * c_pad * 2 + 4 * c_pad * 4)
    tmp_bytes = 6 * tn * c_pad * 4                           # f32 epilogue temps
    footprint = adj_bytes + x_bytes + out_bytes + w_bytes + tmp_bytes
    vmem_limit = max(32 * 1024 * 1024, footprint + 16 * 1024 * 1024)
    vmem_limit = int(min(vmem_limit, vmem_cap - 8 * 1024 * 1024,
                         100 * 1024 * 1024))

    cost = pl.CostEstimate(
        flops=2 * B * n_pad * n_pad * c_pad + 8 * B * n_pad * c_pad * c_pad,
        transcendentals=0,
        bytes_accessed=int(adj_p.size * adj_p.dtype.itemsize + x_b.size * 2
                           + 4 * c_pad * c_pad * 2 + 4 * c_pad * 4
                           + B * n_pad * c_pad * x.dtype.itemsize))

    kernel = functools.partial(graphconv_kernel, row_tile=tn)
    args = (adj_p, x_b, w1, b1, w2, b2, w3, b3, w4, b4)
    build = functools.partial(_build_call, kernel, B, n_tiles, tn, n_pad, c_pad,
                              x.dtype, vmem_limit, cost)

    if _SINGLE_BUFFER_OK is None:
        try:
            out = jax.block_until_ready(build(True)(*args))
            _SINGLE_BUFFER_OK = True
        except Exception:
            # This JAX build rejects pipeline_mode / Buffered(1): fall back to
            # default double-buffering (correctness identical, more VMEM).
            _SINGLE_BUFFER_OK = False
            out = build(False)(*args)
    else:
        out = build(_SINGLE_BUFFER_OK)(*args)

    return out[:, :N, :C]


def graphconv_ref(x, adj, params):
    """Pure-JAX reference mirroring the kernel's bf16-input / f32-accum math."""
    f32, bf16 = jnp.float32, jnp.bfloat16

    def lin(t, w, b):
        t = jnp.einsum("bnc,cd->bnd", t.astype(bf16), w.astype(bf16),
                       preferred_element_type=f32) + b
        return jnp.maximum(t, 0.0)

    h = jnp.einsum("bij,bjc->bic", adj.astype(bf16), x.astype(bf16),
                   preferred_element_type=f32)
    h = lin(lin(h, params["w1"], params["b1"]), params["w2"], params["b2"])
    z = x.astype(bf16).astype(f32) + h
    z = lin(lin(z, params["w3"], params["b3"]), params["w4"], params["b4"])
    return z


def init_params(key, channels):
    ks = jax.random.split(key, 8)
    scale = 1.0 / jnp.sqrt(channels)

    def lin(kw, kb):
        # stored as (in, out); equivalent to PyTorch's W^T
        w = jax.random.uniform(kw, (channels, channels), jnp.float32, -scale, scale)
        b = jax.random.uniform(kb, (1, channels), jnp.float32, -scale, scale)
        return w, b

    w1, b1 = lin(ks[0], ks[1])
    w2, b2 = lin(ks[2], ks[3])
    w3, b3 = lin(ks[4], ks[5])
    w4, b4 = lin(ks[6], ks[7])
    return dict(w1=w1, b1=b1, w2=w2, b2=b2, w3=w3, b3=b3, w4=w4, b4=b4)


if __name__ == "__main__":
    key = jax.random.PRNGKey(0)
    k_x, k_adj, k_p, k_x2, k_adj2 = jax.random.split(key, 5)

    # Case 1: small graph, single row tile (B=2, N=16, C=32).
    B, N, C = 2, 16, 32
    x = jax.random.normal(k_x, (B, N, C), dtype=jnp.float32)
    adj = jax.random.uniform(k_adj, (B, N, N), dtype=jnp.float32)
    params = init_params(k_p, C)

    out = jax.block_until_ready(graphconv(x, adj, params))
    assert out.shape == (B, N, C)
    ref = graphconv_ref(x, adj, params)
    assert jnp.allclose(out, ref, atol=2e-3, rtol=2e-3), \
        float(jnp.max(jnp.abs(out - ref)))

    # Case 2: multi-tile + padded path (B=1, N=200 -> n_pad=256, >=2 row tiles),
    # row-normalized adjacency as is typical for GCNs.
    B2, N2, C2 = 1, 200, 64
    x2 = jax.random.normal(k_x2, (B2, N2, C2), dtype=jnp.float32)
    adj2 = jax.random.uniform(k_adj2, (B2, N2, N2), dtype=jnp.float32) / N2
    params2 = init_params(k_p, C2)

    out2 = jax.block_until_ready(graphconv(x2, adj2, params2))
    assert out2.shape == (B2, N2, C2)
    ref2 = graphconv_ref(x2, adj2, params2)
    assert jnp.allclose(out2, ref2, atol=5e-3, rtol=5e-3), \
        float(jnp.max(jnp.abs(out2 - ref2)))

    print("KERNEL_OK")
</pallas_src>

<mosaic_0001>
module attributes {stable_mosaic.version = 11 : i64} {
  func.func @graphconv_kernel(%arg0: i32, %arg1: i32, %arg2: memref<1x128x128xf32, #tpu.memory_space<vmem>>, %arg3: memref<1x128x128xbf16, #tpu.memory_space<vmem>>, %arg4: memref<128x128xbf16, #tpu.memory_space<vmem>>, %arg5: memref<1x128xf32, #tpu.memory_space<vmem>>, %arg6: memref<128x128xbf16, #tpu.memory_space<vmem>>, %arg7: memref<1x128xf32, #tpu.memory_space<vmem>>, %arg8: memref<128x128xbf16, #tpu.memory_space<vmem>>, %arg9: memref<1x128xf32, #tpu.memory_space<vmem>>, %arg10: memref<128x128xbf16, #tpu.memory_space<vmem>>, %arg11: memref<1x128xf32, #tpu.memory_space<vmem>>, %arg12: memref<1x128x128xf32, #tpu.memory_space<vmem>>) attributes {dimension_semantics = [#tpu.dimension_semantics<parallel>, #tpu.dimension_semantics<parallel>], iteration_bounds = array<i64: 2, 1>, scalar_prefetch = 0 : i64, scratch_operands = 0 : i64, tpu.core_type = #tpu.core_type<tc>, window_params = [{transform_indices = @transform_0, window_bounds = array<i64: 1, 128, 128>}, {pipeline_mode = #tpu.pipeline_mode<synchronous>, transform_indices = @transform_1, window_bounds = array<i64: 1, 128, 128>}, {pipeline_mode = #tpu.pipeline_mode<synchronous>, transform_indices = @transform_2, window_bounds = array<i64: 128, 128>}, {pipeline_mode = #tpu.pipeline_mode<synchronous>, transform_indices = @transform_3, window_bounds = array<i64: 1, 128>}, {pipeline_mode = #tpu.pipeline_mode<synchronous>, transform_indices = @transform_4, window_bounds = array<i64: 128, 128>}, {pipeline_mode = #tpu.pipeline_mode<synchronous>, transform_indices = @transform_5, window_bounds = array<i64: 1, 128>}, {pipeline_mode = #tpu.pipeline_mode<synchronous>, transform_indices = @transform_6, window_bounds = array<i64: 128, 128>}, {pipeline_mode = #tpu.pipeline_mode<synchronous>, transform_indices = @transform_7, window_bounds = array<i64: 1, 128>}, {pipeline_mode = #tpu.pipeline_mode<synchronous>, transform_indices = @transform_8, window_bounds = array<i64: 128, 128>}, {pipeline_mode = #tpu.pipeline_mode<synchronous>, transform_indices = @transform_9, window_bounds = array<i64: 1, 128>}, {transform_indices = @transform_10, window_bounds = array<i64: 1, 128, 128>}]} {
    %c0 = arith.constant 0 : index
    %c0_0 = arith.constant 0 : index
    %c0_1 = arith.constant 0 : index
    %0 = vector.load %arg2[%c0, %c0_0, %c0_1] : memref<1x128x128xf32, #tpu.memory_space<vmem>>, vector<1x128x128xf32>
    %1 = vector.shape_cast %0 : vector<1x128x128xf32> to vector<128x128xf32>
    %2 = arith.truncf %1 : vector<128x128xf32> to vector<128x128xbf16>
    %c0_2 = arith.constant 0 : index
    %c0_3 = arith.constant 0 : index
    %c0_4 = arith.constant 0 : index
    %3 = vector.load %arg3[%c0_2, %c0_3, %c0_4] : memref<1x128x128xbf16, #tpu.memory_space<vmem>>, vector<1x128x128xbf16>
    %4 = vector.shape_cast %3 : vector<1x128x128xbf16> to vector<128x128xbf16>
    %cst = arith.constant dense<0.000000e+00> : vector<128x128xf32>
    %5 = tpu.matmul %2, %4, %cst {dimension_numbers = #tpu.dot_dimension_numbers<[1], [0], [0], [1], [0, 0, 1, 1], [], []>} : vector<128x128xbf16>, vector<128x128xbf16>, vector<128x128xf32> -> vector<128x128xf32>
    %6 = arith.truncf %5 : vector<128x128xf32> to vector<128x128xbf16>
    %c0_5 = arith.constant 0 : index
    %c0_6 = arith.constant 0 : index
    %7 = vector.load %arg4[%c0_5, %c0_6] : memref<128x128xbf16, #tpu.memory_space<vmem>>, vector<128x128xbf16>
    %cst_7 = arith.constant dense<0.000000e+00> : vector<128x128xf32>
    %8 = tpu.matmul %6, %7, %cst_7 {dimension_numbers = #tpu.dot_dimension_numbers<[1], [0], [0], [1], [0, 0, 1, 1], [], []>} : vector<128x128xbf16>, vector<128x128xbf16>, vector<128x128xf32> -> vector<128x128xf32>
    %c0_8 = arith.constant 0 : index
    %c0_9 = arith.constant 0 : index
    %9 = vector.load %arg5[%c0_8, %c0_9] : memref<1x128xf32, #tpu.memory_space<vmem>>, vector<1x128xf32>
    %10 = vector.broadcast %9 : vector<1x128xf32> to vector<128x128xf32>
    %11 = arith.addf %8, %10 : vector<128x128xf32>
    %cst_10 = arith.constant 0.000000e+00 : f32
    %12 = vector.broadcast %cst_10 : f32 to vector<128x128xf32>
    %13 = arith.maximumf %11, %12 : vector<128x128xf32>
    %14 = arith.truncf %13 : vector<128x128xf32> to vector<128x128xbf16>
    %c0_11 = arith.constant 0 : index
    %c0_12 = arith.constant 0 : index
    %15 = vector.load %arg6[%c0_11, %c0_12] : memref<128x128xbf16, #tpu.memory_space<vmem>>, vector<128x128xbf16>
    %cst_13 = arith.constant dense<0.000000e+00> : vector<128x128xf32>
    %16 = tpu.matmul %14, %15, %cst_13 {dimension_numbers = #tpu.dot_dimension_numbers<[1], [0], [0], [1], [0, 0, 1, 1], [], []>} : vector<128x128xbf16>, vector<128x128xbf16>, vector<128x128xf32> -> vector<128x128xf32>
    %c0_14 = arith.constant 0 : index
    %c0_15 = arith.constant 0 : index
    %17 = vector.load %arg7[%c0_14, %c0_15] : memref<1x128xf32, #tpu.memory_space<vmem>>, vector<1x128xf32>
    %18 = vector.broadcast %17 : vector<1x128xf32> to vector<128x128xf32>
    %19 = arith.addf %16, %18 : vector<128x128xf32>
    %cst_16 = arith.constant 0.000000e+00 : f32
    %20 = vector.broadcast %cst_16 : f32 to vector<128x128xf32>
    %21 = arith.maximumf %19, %20 : vector<128x128xf32>
    %c128_i32 = arith.constant 128 : i32
    %22 = arith.muli %arg1, %c128_i32 : i32
    %23 = tpu.assume_multiple %22, 128 : i32
    %c0_17 = arith.constant 0 : index
    %24 = arith.index_cast %23 : i32 to index
    %c0_18 = arith.constant 0 : index
    %25 = vector.load %arg3[%c0_17, %24, %c0_18] : memref<1x128x128xbf16, #tpu.memory_space<vmem>>, vector<1x128x128xbf16>
    %26 = vector.shape_cast %25 : vector<1x128x128xbf16> to vector<128x128xbf16>
    %27 = arith.extf %26 : vector<128x128xbf16> to vector<128x128xf32>
    %28 = arith.addf %27, %21 : vector<128x128xf32>
    %29 = arith.truncf %28 : vector<128x128xf32> to vector<128x128xbf16>
    %c0_19 = arith.constant 0 : index
    %c0_20 = arith.constant 0 : index
    %30 = vector.load %arg8[%c0_19, %c0_20] : memref<128x128xbf16, #tpu.memory_space<vmem>>, vector<128x128xbf16>
    %cst_21 = arith.constant dense<0.000000e+00> : vector<128x128xf32>
    %31 = tpu.matmul %29, %30, %cst_21 {dimension_numbers = #tpu.dot_dimension_numbers<[1], [0], [0], [1], [0, 0, 1, 1], [], []>} : vector<128x128xbf16>, vector<128x128xbf16>, vector<128x128xf32> -> vector<128x128xf32>
    %c0_22 = arith.constant 0 : index
    %c0_23 = arith.constant 0 : index
    %32 = vector.load %arg9[%c0_22, %c0_23] : memref<1x128xf32, #tpu.memory_space<vmem>>, vector<1x128xf32>
    %33 = vector.broadcast %32 : vector<1x128xf32> to vector<128x128xf32>
    %34 = arith.addf %31, %33 : vector<128x128xf32>
    %cst_24 = arith.constant 0.000000e+00 : f32
    %35 = vector.broadcast %cst_24 : f32 to vector<128x128xf32>
    %36 = arith.maximumf %34, %35 : vector<128x128xf32>
    %37 = arith.truncf %36 : vector<128x128xf32> to vector<128x128xbf16>
    %c0_25 = arith.constant 0 : index
    %c0_26 = arith.constant 0 : index
    %38 = vector.load %arg10[%c0_25, %c0_26] : memref<128x128xbf16, #tpu.memory_space<vmem>>, vector<128x128xbf16>
    %cst_27 = arith.constant dense<0.000000e+00> : vector<128x128xf32>
    %39 = tpu.matmul %37, %38, %cst_27 {dimension_numbers = #tpu.dot_dimension_numbers<[1], [0], [0], [1], [0, 0, 1, 1], [], []>} : vector<128x128xbf16>, vector<128x128xbf16>, vector<128x128xf32> -> vector<128x128xf32>
    %c0_28 = arith.constant 0 : index
    %c0_29 = arith.constant 0 : index
    %40 = vector.load %arg11[%c0_28, %c0_29] : memref<1x128xf32, #tpu.memory_space<vmem>>, vector<1x128xf32>
    %41 = vector.broadcast %40 : vector<1x128xf32> to vector<128x128xf32>
    %42 = arith.addf %39, %41 : vector<128x128xf32>
    %cst_30 = arith.constant 0.000000e+00 : f32
    %43 = vector.broadcast %cst_30 : f32 to vector<128x128xf32>
    %44 = arith.maximumf %42, %43 : vector<128x128xf32>
    %c0_31 = arith.constant 0 : index
    %c0_32 = arith.constant 0 : index
    %c0_33 = arith.constant 0 : index
    %45 = vector.load %arg12[%c0_31, %c0_32, %c0_33] : memref<1x128x128xf32, #tpu.memory_space<vmem>>, vector<1x128x128xf32>
    %46 = vector.shape_cast %45 : vector<1x128x128xf32> to vector<128x128xf32>
    %47 = vector.shape_cast %44 : vector<128x128xf32> to vector<1x128x128xf32>
    tpu.vector_store %arg12[%c0_31, %c0_32, %c0_33], %47 {strides = array<i32>} : memref<1x128x128xf32, #tpu.memory_space<vmem>>, vector<1x128x128xf32>,
    return
  }
  func.func @transform_0(%arg0: i32, %arg1: i32) -> (i32, i32, i32) {
    %c0_i32 = arith.constant 0 : i32
    %c0_i32_0 = arith.constant 0 : i32
    return %arg0, %arg1, %c0_i32 : i32, i32, i32
  }
  func.func @transform_1(%arg0: i32, %arg1: i32) -> (i32, i32, i32) {
    %c0_i32 = arith.constant 0 : i32
    %c0_i32_0 = arith.constant 0 : i32
    %c0_i32_1 = arith.constant 0 : i32
    return %arg0, %c0_i32, %c0_i32_0 : i32, i32, i32
  }
  func.func @transform_2(%arg0: i32, %arg1: i32) -> (i32, i32) {
    %c0_i32 = arith.constant 0 : i32
    %c0_i32_0 = arith.constant 0 : i32
    %c0_i32_1 = arith.constant 0 : i32
    return %c0_i32, %c0_i32_0 : i32, i32
  }
  func.func @transform_3(%arg0: i32, %arg1: i32) -> (i32, i32) {
    %c0_i32 = arith.constant 0 : i32
    %c0_i32_0 = arith.constant 0 : i32
    %c0_i32_1 = arith.constant 0 : i32
    return %c0_i32, %c0_i32_0 : i32, i32
  }
  func.func @transform_4(%arg0: i32, %arg1: i32) -> (i32, i32) {
    %c0_i32 = arith.constant 0 : i32
    %c0_i32_0 = arith.constant 0 : i32
    %c0_i32_1 = arith.constant 0 : i32
    return %c0_i32, %c0_i32_0 : i32, i32
  }
  func.func @transform_5(%arg0: i32, %arg1: i32) -> (i32, i32) {
    %c0_i32 = arith.constant 0 : i32
    %c0_i32_0 = arith.constant 0 : i32
    %c0_i32_1 = arith.constant 0 : i32
    return %c0_i32, %c0_i32_0 : i32, i32
  }
  func.func @transform_6(%arg0: i32, %arg1: i32) -> (i32, i32) {
    %c0_i32 = arith.constant 0 : i32
    %c0_i32_0 = arith.constant 0 : i32
    %c0_i32_1 = arith.constant 0 : i32
    return %c0_i32, %c0_i32_0 : i32, i32
  }
  func.func @transform_7(%arg0: i32, %arg1: i32) -> (i32, i32) {
    %c0_i32 = arith.constant 0 : i32
    %c0_i32_0 = arith.constant 0 : i32
    %c0_i32_1 = arith.constant 0 : i32
    return %c0_i32, %c0_i32_0 : i32, i32
  }
  func.func @transform_8(%arg0: i32, %arg1: i32) -> (i32, i32) {
    %c0_i32 = arith.constant 0 : i32
    %c0_i32_0 = arith.constant 0 : i32
    %c0_i32_1 = arith.constant 0 : i32
    return %c0_i32, %c0_i32_0 : i32, i32
  }
  func.func @transform_9(%arg0: i32, %arg1: i32) -> (i32, i32) {
    %c0_i32 = arith.constant 0 : i32
    %c0_i32_0 = arith.constant 0 : i32
    %c0_i32_1 = arith.constant 0 : i32
    return %c0_i32, %c0_i32_0 : i32, i32
  }
  func.func @transform_10(%arg0: i32, %arg1: i32) -> (i32, i32, i32) {
    %c0_i32 = arith.constant 0 : i32
    %c0_i32_0 = arith.constant 0 : i32
    return %arg0, %arg1, %c0_i32 : i32, i32, i32
  }
}

module attributes {stable_mosaic.version = 11 : i64} {
  func.func @graphconv_kernel(%arg0: i32, %arg1: i32, %arg2: memref<1x128x128xf32, #tpu.memory_space<vmem>>, %arg3: memref<1x128x128xbf16, #tpu.memory_space<vmem>>, %arg4: memref<128x128xbf16, #tpu.memory_space<vmem>>, %arg5: memref<1x128xf32, #tpu.memory_space<vmem>>, %arg6: memref<128x128xbf16, #tpu.memory_space<vmem>>, %arg7: memref<1x128xf32, #tpu.memory_space<vmem>>, %arg8: memref<128x128xbf16, #tpu.memory_space<vmem>>, %arg9: memref<1x128xf32, #tpu.memory_space<vmem>>, %arg10: memref<128x128xbf16, #tpu.memory_space<vmem>>, %arg11: memref<1x128xf32, #tpu.memory_space<vmem>>, %arg12: memref<1x128x128xf32, #tpu.memory_space<vmem>>) attributes {dimension_semantics = [#tpu.dimension_semantics<parallel>, #tpu.dimension_semantics<parallel>], iteration_bounds = array<i64: 2, 1>, scalar_prefetch = 0 : i64, scratch_operands = 0 : i64, tpu.core_type = #tpu.core_type<tc>, window_params = [{transform_indices = @transform_0, window_bounds = array<i64: 1, 128, 128>}, {transform_indices = @transform_1, window_bounds = array<i64: 1, 128, 128>}, {pipeline_mode = #tpu.pipeline_mode<synchronous>, transform_indices = @transform_2, window_bounds = array<i64: 128, 128>}, {pipeline_mode = #tpu.pipeline_mode<synchronous>, transform_indices = @transform_3, window_bounds = array<i64: 1, 128>}, {pipeline_mode = #tpu.pipeline_mode<synchronous>, transform_indices = @transform_4, window_bounds = array<i64: 128, 128>}, {pipeline_mode = #tpu.pipeline_mode<synchronous>, transform_indices = @transform_5, window_bounds = array<i64: 1, 128>}, {pipeline_mode = #tpu.pipeline_mode<synchronous>, transform_indices = @transform_6, window_bounds = array<i64: 128, 128>}, {pipeline_mode = #tpu.pipeline_mode<synchronous>, transform_indices = @transform_7, window_bounds = array<i64: 1, 128>}, {pipeline_mode = #tpu.pipeline_mode<synchronous>, transform_indices = @transform_8, window_bounds = array<i64: 128, 128>}, {pipeline_mode = #tpu.pipeline_mode<synchronous>, transform_indices = @transform_9, window_bounds = array<i64: 1, 128>}, {transform_indices = @transform_10, window_bounds = array<i64: 1, 128, 128>}]} {
    %c0 = arith.constant 0 : index
    %c0_0 = arith.constant 0 : index
    %c0_1 = arith.constant 0 : index
    %0 = vector.load %arg2[%c0, %c0_0, %c0_1] : memref<1x128x128xf32, #tpu.memory_space<vmem>>, vector<1x128x128xf32>
    %1 = vector.shape_cast %0 : vector<1x128x128xf32> to vector<128x128xf32>
    %2 = arith.truncf %1 : vector<128x128xf32> to vector<128x128xbf16>
    %c0_2 = arith.constant 0 : index
    %c0_3 = arith.constant 0 : index
    %c0_4 = arith.constant 0 : index
    %3 = vector.load %arg3[%c0_2, %c0_3, %c0_4] : memref<1x128x128xbf16, #tpu.memory_space<vmem>>, vector<1x128x128xbf16>
    %4 = vector.shape_cast %3 : vector<1x128x128xbf16> to vector<128x128xbf16>
    %cst = arith.constant dense<0.000000e+00> : vector<128x128xf32>
    %5 = tpu.matmul %2, %4, %cst {dimension_numbers = #tpu.dot_dimension_numbers<[1], [0], [0], [1], [0, 0, 1, 1], [], []>} : vector<128x128xbf16>, vector<128x128xbf16>, vector<128x128xf32> -> vector<128x128xf32>
    %6 = arith.truncf %5 : vector<128x128xf32> to vector<128x128xbf16>
    %c0_5 = arith.constant 0 : index
    %c0_6 = arith.constant 0 : index
    %7 = vector.load %arg4[%c0_5, %c0_6] : memref<128x128xbf16, #tpu.memory_space<vmem>>, vector<128x128xbf16>
    %cst_7 = arith.constant dense<0.000000e+00> : vector<128x128xf32>
    %8 = tpu.matmul %6, %7, %cst_7 {dimension_numbers = #tpu.dot_dimension_numbers<[1], [0], [0], [1], [0, 0, 1, 1], [], []>} : vector<128x128xbf16>, vector<128x128xbf16>, vector<128x128xf32> -> vector<128x128xf32>
    %c0_8 = arith.constant 0 : index
    %c0_9 = arith.constant 0 : index
    %9 = vector.load %arg5[%c0_8, %c0_9] : memref<1x128xf32, #tpu.memory_space<vmem>>, vector<1x128xf32>
    %10 = vector.broadcast %9 : vector<1x128xf32> to vector<128x128xf32>
    %11 = arith.addf %8, %10 : vector<128x128xf32>
    %cst_10 = arith.constant 0.000000e+00 : f32
    %12 = vector.broadcast %cst_10 : f32 to vector<128x128xf32>
    %13 = arith.maximumf %11, %12 : vector<128x128xf32>
    %14 = arith.truncf %13 : vector<128x128xf32> to vector<128x128xbf16>
    %c0_11 = arith.constant 0 : index
    %c0_12 = arith.constant 0 : index
    %15 = vector.load %arg6[%c0_11, %c0_12] : memref<128x128xbf16, #tpu.memory_space<vmem>>, vector<128x128xbf16>
    %cst_13 = arith.constant dense<0.000000e+00> : vector<128x128xf32>
    %16 = tpu.matmul %14, %15, %cst_13 {dimension_numbers = #tpu.dot_dimension_numbers<[1], [0], [0], [1], [0, 0, 1, 1], [], []>} : vector<128x128xbf16>, vector<128x128xbf16>, vector<128x128xf32> -> vector<128x128xf32>
    %c0_14 = arith.constant 0 : index
    %c0_15 = arith.constant 0 : index
    %17 = vector.load %arg7[%c0_14, %c0_15] : memref<1x128xf32, #tpu.memory_space<vmem>>, vector<1x128xf32>
    %18 = vector.broadcast %17 : vector<1x128xf32> to vector<128x128xf32>
    %19 = arith.addf %16, %18 : vector<128x128xf32>
    %cst_16 = arith.constant 0.000000e+00 : f32
    %20 = vector.broadcast %cst_16 : f32 to vector<128x128xf32>
    %21 = arith.maximumf %19, %20 : vector<128x128xf32>
    %c128_i32 = arith.constant 128 : i32
    %22 = arith.muli %arg1, %c128_i32 : i32
    %23 = tpu.assume_multiple %22, 128 : i32
    %c0_17 = arith.constant 0 : index
    %24 = arith.index_cast %23 : i32 to index
    %c0_18 = arith.constant 0 : index
    %25 = vector.load %arg3[%c0_17, %24, %c0_18] : memref<1x128x128xbf16, #tpu.memory_space<vmem>>, vector<1x128x128xbf16>
    %26 = vector.shape_cast %25 : vector<1x128x128xbf16> to vector<128x128xbf16>
    %27 = arith.extf %26 : vector<128x128xbf16> to vector<128x128xf32>
    %28 = arith.addf %27, %21 : vector<128x128xf32>
    %29 = arith.truncf %28 : vector<128x128xf32> to vector<128x128xbf16>
    %c0_19 = arith.constant 0 : index
    %c0_20 = arith.constant 0 : index
    %30 = vector.load %arg8[%c0_19, %c0_20] : memref<128x128xbf16, #tpu.memory_space<vmem>>, vector<128x128xbf16>
    %cst_21 = arith.constant dense<0.000000e+00> : vector<128x128xf32>
    %31 = tpu.matmul %29, %30, %cst_21 {dimension_numbers = #tpu.dot_dimension_numbers<[1], [0], [0], [1], [0, 0, 1, 1], [], []>} : vector<128x128xbf16>, vector<128x128xbf16>, vector<128x128xf32> -> vector<128x128xf32>
    %c0_22 = arith.constant 0 : index
    %c0_23 = arith.constant 0 : index
    %32 = vector.load %arg9[%c0_22, %c0_23] : memref<1x128xf32, #tpu.memory_space<vmem>>, vector<1x128xf32>
    %33 = vector.broadcast %32 : vector<1x128xf32> to vector<128x128xf32>
    %34 = arith.addf %31, %33 : vector<128x128xf32>
    %cst_24 = arith.constant 0.000000e+00 : f32
    %35 = vector.broadcast %cst_24 : f32 to vector<128x128xf32>
    %36 = arith.maximumf %34, %35 : vector<128x128xf32>
    %37 = arith.truncf %36 : vector<128x128xf32> to vector<128x128xbf16>
    %c0_25 = arith.constant 0 : index
    %c0_26 = arith.constant 0 : index
    %38 = vector.load %arg10[%c0_25, %c0_26] : memref<128x128xbf16, #tpu.memory_space<vmem>>, vector<128x128xbf16>
    %cst_27 = arith.constant dense<0.000000e+00> : vector<128x128xf32>
    %39 = tpu.matmul %37, %38, %cst_27 {dimension_numbers = #tpu.dot_dimension_numbers<[1], [0], [0], [1], [0, 0, 1, 1], [], []>} : vector<128x128xbf16>, vector<128x128xbf16>, vector<128x128xf32> -> vector<128x128xf32>
    %c0_28 = arith.constant 0 : index
    %c0_29 = arith.constant 0 : index
    %40 = vector.load %arg11[%c0_28, %c0_29] : memref<1x128xf32, #tpu.memory_space<vmem>>, vector<1x128xf32>
    %41 = vector.broadcast %40 : vector<1x128xf32> to vector<128x128xf32>
    %42 = arith.addf %39, %41 : vector<128x128xf32>
    %cst_30 = arith.constant 0.000000e+00 : f32
    %43 = vector.broadcast %cst_30 : f32 to vector<128x128xf32>
    %44 = arith.maximumf %42, %43 : vector<128x128xf32>
    %c0_31 = arith.constant 0 : index
    %c0_32 = arith.constant 0 : index
    %c0_33 = arith.constant 0 : index
    %45 = vector.load %arg12[%c0_31, %c0_32, %c0_33] : memref<1x128x128xf32, #tpu.memory_space<vmem>>, vector<1x128x128xf32>
    %46 = vector.shape_cast %45 : vector<1x128x128xf32> to vector<128x128xf32>
    %47 = vector.shape_cast %44 : vector<128x128xf32> to vector<1x128x128xf32>
    tpu.vector_store %arg12[%c0_31, %c0_32, %c0_33], %47 {strides = array<i32>} : memref<1x128x128xf32, #tpu.memory_space<vmem>>, vector<1x128x128xf32>,
    return
  }
  func.func @transform_0(%arg0: i32, %arg1: i32) -> (i32, i32, i32) {
    %c0_i32 = arith.constant 0 : i32
    %c0_i32_0 = arith.constant 0 : i32
    return %arg0, %arg1, %c0_i32 : i32, i32, i32
  }
  func.func @transform_1(%arg0: i32, %arg1: i32) -> (i32, i32, i32) {
    %c0_i32 = arith.constant 0 : i32
    %c0_i32_0 = arith.constant 0 : i32
    %c0_i32_1 = arith.constant 0 : i32
    return %arg0, %c0_i32, %c0_i32_0 : i32, i32, i32
  }
  func.func @transform_2(%arg0: i32, %arg1: i32) -> (i32, i32) {
    %c0_i32 = arith.constant 0 : i32
    %c0_i32_0 = arith.constant 0 : i32
    %c0_i32_1 = arith.constant 0 : i32
    return %c0_i32, %c0_i32_0 : i32, i32
  }
  func.func @transform_3(%arg0: i32, %arg1: i32) -> (i32, i32) {
    %c0_i32 = arith.constant 0 : i32
    %c0_i32_0 = arith.constant 0 : i32
    %c0_i32_1 = arith.constant 0 : i32
    return %c0_i32, %c0_i32_0 : i32, i32
  }
  func.func @transform_4(%arg0: i32, %arg1: i32) -> (i32, i32) {
    %c0_i32 = arith.constant 0 : i32
    %c0_i32_0 = arith.constant 0 : i32
    %c0_i32_1 = arith.constant 0 : i32
    return %c0_i32, %c0_i32_0 : i32, i32
  }
  func.func @transform_5(%arg0: i32, %arg1: i32) -> (i32, i32) {
    %c0_i32 = arith.constant 0 : i32
    %c0_i32_0 = arith.constant 0 : i32
    %c0_i32_1 = arith.constant 0 : i32
    return %c0_i32, %c0_i32_0 : i32, i32
  }
  func.func @transform_6(%arg0: i32, %arg1: i32) -> (i32, i32) {
    %c0_i32 = arith.constant 0 : i32
    %c0_i32_0 = arith.constant 0 : i32
    %c0_i32_1 = arith.constant 0 : i32
    return %c0_i32, %c0_i32_0 : i32, i32
  }
  func.func @transform_7(%arg0: i32, %arg1: i32) -> (i32, i32) {
    %c0_i32 = arith.constant 0 : i32
    %c0_i32_0 = arith.constant 0 : i32
    %c0_i32_1 = arith.constant 0 : i32
    return %c0_i32, %c0_i32_0 : i32, i32
  }
  func.func @transform_8(%arg0: i32, %arg1: i32) -> (i32, i32) {
    %c0_i32 = arith.constant 0 : i32
    %c0_i32_0 = arith.constant 0 : i32
    %c0_i32_1 = arith.constant 0 : i32
    return %c0_i32, %c0_i32_0 : i32, i32
  }
  func.func @transform_9(%arg0: i32, %arg1: i32) -> (i32, i32) {
    %c0_i32 = arith.constant 0 : i32
    %c0_i32_0 = arith.constant 0 : i32
    %c0_i32_1 = arith.constant 0 : i32
    return %c0_i32, %c0_i32_0 : i32, i32
  }
  func.func @transform_10(%arg0: i32, %arg1: i32) -> (i32, i32, i32) {
    %c0_i32 = arith.constant 0 : i32
    %c0_i32_0 = arith.constant 0 : i32
    return %arg0, %arg1, %c0_i32 : i32, i32, i32
  }
}

</mosaic_0001>

<bundles_post_ra>
// kernel: tpu_custom_call.1
= control target key start
LH: loop header
LB: loop body
LE: loop exit
PB: predicated region body
PF: predicated region fallthrough
CT: control target
= control target key end

     0   :  { %s2483_s0 = inlined_call_operand.hbm [shape: f32[2,128,128], index: 0, kind: input, shape index: {}]   ;;  %s2484_s1 = inlined_call_operand.hbm [shape: bf16[2,128,128], index: 1, kind: input, shape index: {}]   ;;  %s2485_s2 = inlined_call_operand.hbm [shape: bf16[128,128], index: 2, kind: input, shape index: {}]   ;;  %s2486_s3 = inlined_call_operand.vmem [shape: f32[1,128], index: 3, kind: input, shape index: {}]   ;;  %s2487_s4 = inlined_call_operand.hbm [shape: bf16[128,128], index: 4, kind: input, shape index: {}]   ;;  %s2488_s5 = inlined_call_operand.vmem [shape: f32[1,128], index: 5, kind: input, shape index: {}]   ;;  %s2489_s6 = inlined_call_operand.hbm [shape: bf16[128,128], index: 6, kind: input, shape index: {}]   ;;  %s2490_s7 = inlined_call_operand.vmem [shape: f32[1,128], index: 7, kind: input, shape index: {}]   ;;  %s2491_s8 = inlined_call_operand.hbm [shape: bf16[128,128], index: 8, kind: input, shape index: {}]   ;;  %s2492_s9 = inlined_call_operand.vmem [shape: f32[1,128], index: 9, kind: input, shape index: {}]   ;;  %s2493_s10 = inlined_call_operand.hbm [shape: f32[2,128,128], index: 10, kind: output, shape index: {}]  }
   0x1   :  { %2498 = sst [smem:[#allocation23_spill]] %s2484_s1 }
   0x2   :  { %2499 = sst [smem:[#allocation24_spill]] %s2488_s5 }
   0x3   :  { %2500 = sst [smem:[#allocation25_spill]] %s2490_s7 }
   0x4   :  { %2501 = sst [smem:[#allocation26_spill]] %s2492_s9 }
   0x5   :  { %2502 = sst [smem:[#allocation27_spill]] %s2493_s10 }
   0x6   :  { %15 = vsyncpa [#allocation3], 0 }
   0x7   :  { %17 = vsyncpa [#allocation3 + $0x1], 0 }
   0x8   :  { %18 = vsyncpa [#allocation6], 0 }
   0x9   :  { %19 = vsyncpa [#allocation9], 0 }
   0xa   :  { %20 = vsyncpa [#allocation12], 0 }
   0xb   :  { %21 = vsyncpa [#allocation4], 0 }
   0xc   :  { %23 = vsyncpa [#allocation4 + $0x1], 0  ;;  %s2174_s13 = smov 0   ;;  %s2176_s14 = smov 0  }
   0xd   :  { %s2178_s15 = smov 0   ;;  %s2180_s16 = smov 0  }
   0xe   :  { %s2182_s17 = smov 0   ;;  %s2184_s18 = smov 0  }
   0xf LB: > { %2503 = sst [smem:[#allocation20_spill]] %s2086_s13  ;;  %s1418_s19 = sadd.s32 4294967295, %s2106_s18   ;;  %s2106_s18 = sphi %s2184_s18, %s29_s18   ;;  %s2102_s17 = sphi %s2182_s17, %s2529_s17   ;;  %s2098_s16 = sphi %s2180_s16, %s2528_s16   ;;  %s2094_s15 = sphi %s2178_s15, %s2527_s15   ;;  %s2090_s14 = sphi %s2176_s14, %s2526_s14   ;;  %s2086_s13 = sphi %s2174_s13, %s2525_s13  }
  0x10   : > { %2504 = sst [smem:[#allocation21_spill]] %s2098_s16  ;;  %s1419_s20 = sadd.s32 4294967294, %s2106_s18  }
  0x11   : > { %p63_p0 = scmp.ne.s32.totalorder %s2090_s14, %s2086_s13  ;;  %p2208_p1 = scmp.eq.s32.totalorder %s1418_s19, 0 }
  0x12   : > { %p2212_p2 = scmp.eq.s32.totalorder %s1418_s19, 1  ;;  %p289_p3 = scmp.eq.s32.totalorder %s1419_s20, 1 }
  0x13   : > { %p2218_p4 = por %p2208_p1, %p63_p0  ;;  %p1420_p5 = scmp.ge.s32.totalorder %s2106_s18, 1 }
  0x14   : > { %p2223_p6 = por %p289_p3, %p63_p0  ;;  %p296_p7 = scmp.lt.s32.totalorder %s2106_s18, 3 }
  0x15   : > { %s1603_s25 = sshll.u32 %s2098_s16, 6  ;;  %s2511_s1 = sld [smem:[#allocation23_spill]] }
  0x16   : > { %s2508_s24 = scalar_select %p2223_p6, 1, 0 }
  0x17   : > { %p2229_p8 = pnand %p1420_p5, %p296_p7  ;;  %s2108_s11 = smov [#allocation5]  }
  0x18   : > { %2509 = sst [smem:[#allocation22_spill]] %s2508_s24  ;;  %s312_s12 = sshll.u32 %s2108_s11, 4  ;;  %s313_s12 = int_to_ptr.vmem [resolvable:$true] %s312_s12 }
  0x19   : > { %p1731_p9 = pneg %p2229_p8 }
  0x1b   : > { %s309_s29 = scalar_lea.hbm %s2511_s1, %s1603_s25  ;;  %p2240_p10 = pnand %p1731_p9, %p2218_p4 }
  0x1c   : > { %s310_s30 = sshll.u32 %s309_s29, 4  ;;  %p2247_p12 = pnand %p1731_p9, %p2208_p1  ;;  %s311_s30 = int_to_ptr.hbm [resolvable:$true] %s310_s30 }
  0x1d   : > { %s1828_s25 = sshra.s32 %s311_s30, 4  ;;  %p1832_p0 = pneg %p2240_p10  ;;  %s1829_s25 = int_to_ptr.hbm [resolvable:$true] %s1828_s25 }
  0x1e   : > { %s1830_s27 = scalar_lea.hbm %s1829_s25, 64  ;;  %s1835_s11 = scalar_lea.hbm %s2511_s1, 128 }
  0x1f   : > { %p1831_p13 = scmp.ne.s32.totalorder %s1829_s25, %s1830_s27  ;;  %p1836_p7 = scmp.lt.s32.totalorder %s1829_s25, %s2511_s1 }
  0x20   : > { %p1837_p9 = scmp.lt.s32.totalorder %s1835_s11, %s1830_s27 }
  0x21   : > { %p1833_p3 = pnand %p1832_p0, %p1831_p13 }
  0x22   : > { %p1838_p11 = por %p1837_p9, %p1836_p7 }
  0x23   : > { %p1834_p5 = pneg %p1833_p3 }
  0x25   : > { %p1839_p6 = pnand %p1838_p11, %p1834_p5 }
  0x27   : > { %1842 = shalt.err (!%p1839_p6)
}
  0x28   : > { %s2109_s10 = smov 64   ;;  %s2110_s16 = smov 4  }
  0x29   : > { %1734 = dma.hbm_to_vmem [thread:$0]  (!%p2240_p10), %s311_s30, 1024, %s313_s12, [#allocation6], %s2109_s10, %s2109_s10, %s2110_s16  }
  0x2a   : > { %s341_s28 = sshll.u32 %s2487_s4, 4  ;;  %s2111_s29 = smov [#allocation8]   ;;  %s342_s28 = int_to_ptr.hbm [resolvable:$true] %s341_s28 }
  0x2b   : > { %s343_s5 = sshll.u32 %s2111_s29, 4  ;;  %s324_s25 = sshll.u32 %s2485_s2, 4  ;;  %s344_s5 = int_to_ptr.vmem [resolvable:$true] %s343_s5  ;;  %s325_s25 = int_to_ptr.hbm [resolvable:$true] %s324_s25 }
  0x2c   : > { %1740 = dma.hbm_to_vmem [thread:$0]  (!%p2247_p12), %s342_s28, 1024, %s344_s5, [#allocation9], %s2109_s10, %s2109_s10, %s2110_s16  }
  0x2d   : > { %s358_s30 = sshll.u32 %s2489_s6, 4  ;;  %s2112_s7 = smov [#allocation7]   ;;  %s359_s30 = int_to_ptr.hbm [resolvable:$true] %s358_s30 }
  0x2e   : > { %s326_s9 = sshll.u32 %s2112_s7, 4  ;;  %s2113_s12 = smov [#allocation10]   ;;  %s327_s9 = int_to_ptr.vmem [resolvable:$true] %s326_s9 }
  0x2f   : > { %1737 = dma.hbm_to_vmem [thread:$0]  (!%p2247_p12), %s325_s25, 1024, %s327_s9, [#allocation6], %s2109_s10, %s2109_s10, %s2110_s16  }
  0x30   : > { %s360_s19 = sshll.u32 %s2113_s12, 4  ;;  %s375_s28 = sshll.u32 %s2491_s8, 4  ;;  %s361_s19 = int_to_ptr.vmem [resolvable:$true] %s360_s19  ;;  %s376_s28 = int_to_ptr.hbm [resolvable:$true] %s375_s28 }
  0x31   : > { %1743 = dma.hbm_to_vmem [thread:$0]  (!%p2247_p12), %s359_s30, 1024, %s361_s19, [#allocation9], %s2109_s10, %s2109_s10, %s2110_s16  }
  0x32   : > { %s2114_s13 = smov [#allocation11]   ;;  %s41_s25 = sadd.s32 1, %s2102_s17 }
  0x33   : > { %s377_s24 = sshll.u32 %s2114_s13, 4  ;;  %p43_p6 = scmp.ge.s32.totalorder %s41_s25, 2  ;;  %s378_s24 = int_to_ptr.vmem [resolvable:$true] %s377_s24 }
  0x34   : > { %1746 = dma.hbm_to_vmem [thread:$0]  (!%p2247_p12), %s376_s28, 1024, %s378_s24, [#allocation12], %s2109_s10, %s2109_s10, %s2110_s16  }
  0x35   : > { %s50_s27 = sadd.s32 1, %s2094_s15  ;;  %p57_p10 = scmp.ne.s32.totalorder %s2094_s15, %s2090_s14 }
  0x36   : > { %p58_p11 = scmp.eq.s32.totalorder %s2106_s18, 0  ;;  %s2531_s25 = smov (%p43_p6, %s41_s25), 0 }
  0x37   : > { %p2294_p0 = por %p2212_p2, %p57_p10  ;;  %s45_s20 = ssub.s32 %s2102_s17, %s2531_s25 }
  0x38   : > { %p2288_p13 = por %p58_p11, %p57_p10  ;;  %p1759_p12 = scmp.lt.s32.totalorder %s2106_s18, 2 }
  0x39   : > { %p48_p3 = scmp.eq.s32.totalorder %s45_s20, 0  ;;  %s394_s10 = sand.u32 1, %s2094_s15  }
  0x3a   : > { %s1428_s16 = sshll.u32 %s394_s10, 7  ;;  %s1604_s9 = sshll.u32 %s2102_s17, 7 }
  0x3b   : > { %s2303_s7 = scalar_select %p48_p3, %s2094_s15, %s50_s27  }
  0x3c   : > { %s405_s29 = scalar_lea.hbm %s2483_s0, %s1604_s9  ;;  %s398_s5 = scalar_lea.vmem [#allocation2], %s1428_s16 }
  0x3d   : > { %s408_s28 = sshll.u32 %s398_s5, 4  ;;  %s406_s22 = sshll.u32 %s405_s29, 4  ;;  %s409_s28 = int_to_ptr.vmem [resolvable:$true] %s408_s28  ;;  %s407_s22 = int_to_ptr.hbm [resolvable:$true] %s406_s22 }
  0x3e   : > { %p1748_p2 = pnand %p1759_p12, %p2288_p13  ;;  %s395_s13 = scalar_lea.sflag [#allocation3], %s394_s10 }
  0x3f   : > { %s2115_s24 = smov 128   ;;  %s2116_s1 = smov 8  }
  0x40   : > { %1750 = dma.hbm_to_vmem [thread:$0]  (!%p1748_p2), %s407_s22, 2048, %s409_s28, %s395_s13, %s2115_s24, %s2115_s24, %s2116_s1  }
  0x41   : > { %420 = sbr.rel (%p2229_p8) target bundleno = 935 (0x3a7), region = 60  ;;  %s2314_s27 = sand.u32 (!%p2229_p8), 1, %s2090_s14  }
  0x42   : > { %s1432_s20 = sshll.u32 (!%p2229_p8), %s2314_s27, 7  ;;  %s423_s16 = scalar_lea.sflag (!%p2229_p8), [#allocation3], %s2314_s27 }
  0x43   : > { %s2320_s9 = scalar_lea.vmem (!%p2229_p8), [#allocation2], %s1432_s20 }
  0x46   : > { %2061 = dma.done.wait (%p2218_p4), %s423_s16, 2048  }
  0x47   : > { %2063 = vsyncadd (%p2218_p4), %s423_s16, 4294965248 }
  0x48   : > { %2065 = dma.done.wait (%p2218_p4), [#allocation6], 1024  }
  0x49   : > { %2067 = vsyncadd (%p2218_p4), [#allocation6], 4294966272 }
  0x4a   : > { %2069 = dma.done.wait (%p2208_p1), [#allocation6], 1024  }
  0x4b   : > { %2071 = vsyncadd (%p2208_p1), [#allocation6], 4294966272 }
  0x4c   : > { %2073 = dma.done.wait (%p2208_p1), [#allocation9], 2048  }
  0x4d   : > { %2075 = vsyncadd (%p2208_p1), [#allocation9], 4294965248 }
  0x4e   : > { %2077 = dma.done.wait (%p2208_p1), [#allocation12], 1024  }
  0x4f   : > { %2079 = vsyncadd (%p2208_p1), [#allocation12], 4294966272  ;;  %v1612_v0 = vld [vmem:[#allocation5 + $0x38] sm:$0xff]  ;;  %v1611_v1 = vld [vmem:[#allocation5 + $0x30] sm:$0xff]  ;;  %s2516_s11 = sld [smem:[#allocation24_spill]]  ;;  %s2411_s22 = scalar_lea.vmem [#allocation13], %s1432_s20 }
  0x50   : > { %579 = vmatpush.bf16.msra.mxu0 %v1612_v0  ;;  %1685 = vmatpush.bf16.msra.mxu1 %v1612_v0  ;;  %v1610_v2 = vld [vmem:[#allocation5 + $0x28] sm:$0xff]  ;;  %v1609_v3 = vld [vmem:[#allocation5 + $0x20] sm:$0xff]  ;;  %v1608_v4 = vld [vmem:[#allocation5 + $0x18] sm:$0xff]  ;;  %s2517_s19 = sld [smem:[#allocation25_spill]]  ;;  %s1276_s21 = sshll.u32 %s2411_s22, 4  ;;  %s1277_s21 = int_to_ptr.vmem [resolvable:$true] %s1276_s21 }
  0x51   : > { %1686 = vmatpush.bf16.msra.mxu2 %v1612_v0  ;;  %1687 = vmatpush.bf16.msra.mxu3 %v1612_v0  ;;  %v1607_v5 = vld [vmem:[#allocation5 + $0x10] sm:$0xff]  ;;  %v1606_v6 = vld [vmem:[#allocation5 + $0x8] sm:$0xff]  ;;  %v1605_v7 = vld [vmem:[#allocation5] sm:$0xff]  ;;  %s2518_s28 = sld [smem:[#allocation26_spill]]  ;;  %s1262_s26 = scalar_lea.sflag [#allocation4], %s2314_s27 }
  0x52   : > { %v491_v8 = vld [vmem:[%s2320_s9] sm:$0xff]  ;;  %v492_v9 = vld [vmem:[%s2320_s9 + $0x8] sm:$0xff]  ;;  %v1620_v16 = vld [vmem:[#allocation7 + $0x38] sm:$0xff]  ;;  %s2519_s13 = sld [smem:[#allocation21_spill]] }
  0x53   : > { %v495_v10 = vld [vmem:[%s2320_s9 + $0x20] sm:$0xff]  ;;  %v496_v11 = vld [vmem:[%s2320_s9 + $0x28] sm:$0xff]  ;;  %v507_v17 = vpack.c.bf16 %v492_v9, %v491_v8  ;;  %v1619_v21 = vld [vmem:[#allocation7 + $0x30] sm:$0xff] }
  0x54   : > { %580 = vmatpush.bf16.msra.mxu0 %v1611_v1  ;;  %1688 = vmatpush.bf16.msra.mxu1 %v1611_v1  ;;  %v499_v12 = vld [vmem:[%s2320_s9 + $0x40] sm:$0xff]  ;;  %v500_v13 = vld [vmem:[%s2320_s9 + $0x48] sm:$0xff]  ;;  %v509_v18 = vpack.c.bf16 %v496_v11, %v495_v10  ;;  %v493_v24 = vld [vmem:[%s2320_s9 + $0x10] sm:$0xff] }
  0x55   : > { %1689 = vmatpush.bf16.msra.mxu2 %v1611_v1  ;;  %1690 = vmatpush.bf16.msra.mxu3 %v1611_v1  ;;  %v503_v14 = vld [vmem:[%s2320_s9 + $0x60] sm:$0xff]  ;;  %v504_v15 = vld [vmem:[%s2320_s9 + $0x68] sm:$0xff]  ;;  %v511_v19 = vpack.c.bf16 %v500_v13, %v499_v12  ;;  %v494_v25 = vld [vmem:[%s2320_s9 + $0x18] sm:$0xff] }
  0x56   : > { %v513_v20 = vpack.c.bf16 %v504_v15, %v503_v14  ;;  %v1618_v22 = vld [vmem:[#allocation7 + $0x28] sm:$0xff]  ;;  %v1617_v23 = vld [vmem:[#allocation7 + $0x20] sm:$0xff]  ;;  %v497_v26 = vld [vmem:[%s2320_s9 + $0x30] sm:$0xff]  ;;  %v508_v33 = vpack.c.bf16 %v494_v25, %v493_v24 }
  0x57   : > { %v498_v27 = vld [vmem:[%s2320_s9 + $0x38] sm:$0xff]  ;;  %v501_v28 = vld [vmem:[%s2320_s9 + $0x50] sm:$0xff]  ;;  %v1614_v38 = vld [vmem:[#allocation7 + $0x8] sm:$0xff] }
  0x58   : > { %581 = vmatpush.bf16.msra.mxu0 %v1610_v2  ;;  %1691 = vmatpush.bf16.msra.mxu1 %v1610_v2  ;;  %v502_v29 = vld [vmem:[%s2320_s9 + $0x58] sm:$0xff]  ;;  %v505_v30 = vld [vmem:[%s2320_s9 + $0x70] sm:$0xff]  ;;  %v510_v34 = vpack.c.bf16 %v498_v27, %v497_v26  ;;  %v1613_v39 = vld [vmem:[#allocation7] sm:$0xff]  ;;  %s1645_s24 = sshll.u32 %s2519_s13, 7 }
  0x59   : > { %1692 = vmatpush.bf16.msra.mxu2 %v1610_v2  ;;  %1693 = vmatpush.bf16.msra.mxu3 %v1610_v2  ;;  %v506_v31 = vld [vmem:[%s2320_s9 + $0x78] sm:$0xff]  ;;  %v512_v35 = vpack.c.bf16 %v502_v29, %v501_v28  ;;  %v1615_v37 = vld [vmem:[#allocation7 + $0x10] sm:$0xff]  ;;  %v1626_v61 = vld [vmem:[#allocation8 + $0x28] sm:$0xff]  ;;  %s2520_s9 = sld [smem:[#allocation27_spill]] }
  0x5a   : > { %v1616_v32 = vld [vmem:[#allocation7 + $0x18] sm:$0xff]  ;;  %v514_v36 = vpack.c.bf16 %v506_v31, %v505_v30  ;;  %v1627_v60 = vld [vmem:[#allocation8 + $0x30] sm:$0xff]  ;;  %v1625_v62 = vld [vmem:[#allocation8 + $0x20] sm:$0xff] }
  0x5b   : > { %v1628_v55 = vld [vmem:[#allocation8 + $0x38] sm:$0xff]  ;;  %v1623_v2 = vld [vmem:[#allocation8 + $0x10] sm:$0xff]  ;;  %v2361_v9 = vld [vmem:[%s2486_s3] ss:$0 sm:$0xff] }
  0x5c   : > { %582 = vmatpush.bf16.msra.mxu0 %v1609_v3  ;;  %1694 = vmatpush.bf16.msra.mxu1 %v1609_v3  ;;  %v1624_v0 = vld [vmem:[#allocation8 + $0x18] sm:$0xff] }
  0x5d   : > { %1695 = vmatpush.bf16.msra.mxu2 %v1609_v3  ;;  %1696 = vmatpush.bf16.msra.mxu3 %v1609_v3 }
  0x5f   : > { %s1275_s1 = scalar_lea.hbm %s2520_s9, %s1645_s24  ;;  %s2028_s29 = scalar_lea.hbm %s2520_s9, 256 }
  0x60   : > { %583 = vmatpush.bf16.msra.mxu0 %v1608_v4  ;;  %1697 = vmatpush.bf16.msra.mxu1 %v1608_v4  ;;  %s1278_s23 = sshll.u32 %s1275_s1, 4  ;;  %s1279_s23 = int_to_ptr.hbm [resolvable:$true] %s1278_s23 }
  0x61   : > { %1698 = vmatpush.bf16.msra.mxu2 %v1608_v4  ;;  %1699 = vmatpush.bf16.msra.mxu3 %v1608_v4  ;;  %v1622_v4 = vld [vmem:[#allocation8 + $0x8] sm:$0xff] }
  0x64   : > { %584 = vmatpush.bf16.msra.mxu0 %v1607_v5  ;;  %1700 = vmatpush.bf16.msra.mxu1 %v1607_v5 }
  0x65   : > { %1701 = vmatpush.bf16.msra.mxu2 %v1607_v5  ;;  %1702 = vmatpush.bf16.msra.mxu3 %v1607_v5  ;;  %v1621_v5 = vld [vmem:[#allocation8] sm:$0xff] }
  0x68   : > { %585 = vmatpush.bf16.msra.mxu0 %v1606_v6  ;;  %1703 = vmatpush.bf16.msra.mxu1 %v1606_v6 }
  0x69   : > { %1704 = vmatpush.bf16.msra.mxu2 %v1606_v6  ;;  %1705 = vmatpush.bf16.msra.mxu3 %v1606_v6 }
  0x6c   : > { %586 = vmatpush.bf16.msra.mxu0 %v1605_v7  ;;  %1706 = vmatpush.bf16.msra.mxu1 %v1605_v7 }
  0x6d   : > { %1707 = vmatpush.bf16.msra.mxu2 %v1605_v7  ;;  %1708 = vmatpush.bf16.msra.mxu3 %v1605_v7 }
  0x6f   : > { %587 = vmatmul.bf16.vlgmr.msra.gmra.mxu0 %v507_v17  ;;  %597 = vmatmul.bf16.vlgmr.msra.gmra.mxu1 %v509_v18 }
  0x70   : > { %704 = vmatpush.bf16.msrb.mxu1 %v1620_v16  ;;  %607 = vmatmul.bf16.vlgmr.msra.gmra.mxu2 %v511_v19 }
  0x71   : > { %617 = vmatmul.bf16.vlgmr.msra.gmra.mxu3 %v513_v20  ;;  %845 = vmatpush.bf16.msrb.mxu2 %v1628_v55 }
  0x74   : > { %705 = vmatpush.bf16.msrb.mxu1 %v1619_v21 }
  0x75   : > { %846 = vmatpush.bf16.msrb.mxu2 %v1627_v60 }
  0x78   : > { %706 = vmatpush.bf16.msrb.mxu1 %v1618_v22 }
  0x79   : > { %847 = vmatpush.bf16.msrb.mxu2 %v1626_v61 }
  0x7c   : > { %707 = vmatpush.bf16.msrb.mxu1 %v1617_v23 }
  0x7d   : > { %848 = vmatpush.bf16.msrb.mxu2 %v1625_v62 }
  0x7f   : > { %592 = vmatmul.bf16.gmra.mxu0 %v508_v33  ;;  %602 = vmatmul.bf16.gmra.mxu1 %v510_v34 }
  0x80   : > { %708 = vmatpush.bf16.msrb.mxu1 %v1616_v32  ;;  %612 = vmatmul.bf16.gmra.mxu2 %v512_v35 }
  0x81   : > { %622 = vmatmul.bf16.gmra.mxu3 %v514_v36  ;;  %849 = vmatpush.bf16.msrb.mxu2 %v1624_v0  ;;  %v1631_v0 = vld [vmem:[#allocation10 + $0x10] sm:$0xff] }
  0x84   : > { %709 = vmatpush.bf16.msrb.mxu1 %v1615_v37 }
  0x85   : > { %850 = vmatpush.bf16.msrb.mxu2 %v1623_v2 }
  0x88   : > { %710 = vmatpush.bf16.msrb.mxu1 %v1614_v38 }
  0x89   : > { %851 = vmatpush.bf16.msrb.mxu2 %v1622_v4  ;;  %v1630_v4 = vld [vmem:[#allocation10 + $0x8] sm:$0xff] }
  0x8c   : > { %711 = vmatpush.bf16.msrb.mxu1 %v1613_v39 }
  0x8d   : > { %852 = vmatpush.bf16.msrb.mxu2 %v1621_v5 }
  0xec   : > { %v588_v40 = vpop.f32.mrf.mxu0  ;;  %v598_v45 = vpop.f32.mrf.mxu1 }
  0xf3   : > { %v608_v51 = vpop.f32.mrf.mxu2 }
  0xf4   : > { %v590_v41 = vpop.f32.mrf.mxu0  ;;  %v600_v47 = vpop.f32.mrf.mxu1 }
  0xf5   : > { %v628_v42 = vpack.c.bf16 %v590_v41, %v588_v40  ;;  %v630_v48 = vpack.c.bf16 %v600_v47, %v598_v45  ;;  %v618_v58 = vpop.f32.mrf.mxu3 }
  0xf7   : > { %712 = vmatmul.bf16.vlgmr.msrb.gmra.mxu1 %v628_v42 }
  0xfb   : > { %v610_v53 = vpop.f32.mrf.mxu2 }
  0xfc   : > { %v593_v43 = vpop.f32.mrf.mxu0  ;;  %v603_v49 = vpop.f32.mrf.mxu1  ;;  %v632_v54 = vpack.c.bf16 %v610_v53, %v608_v51  ;;  %v1636_v51 = vld [vmem:[#allocation10 + $0x38] sm:$0xff]  ;;  %v1635_v53 = vld [vmem:[#allocation10 + $0x30] sm:$0xff] }
  0xfd   : > { %v620_v63 = vpop.f32.mrf.mxu3  ;;  %1039 = vmatpush.bf16.msrb.mxu3 %v1636_v51 }
  0xfe   : > { %v634_v1 = vpack.c.bf16 %v620_v63, %v618_v58  ;;  %v1633_v58 = vld [vmem:[#allocation10 + $0x20] sm:$0xff]  ;;  %v1632_v63 = vld [vmem:[#allocation10 + $0x18] sm:$0xff] }
 0x101   : > { %1040 = vmatpush.bf16.msrb.mxu3 %v1635_v53 }
 0x103   : > { %v613_v56 = vpop.f32.mrf.mxu2 }
 0x104   : > { %v595_v44 = vpop.f32.mrf.mxu0  ;;  %v605_v50 = vpop.f32.mrf.mxu1 }
 0x105   : > { %v629_v46 = vpack.c.bf16 %v595_v44, %v593_v43  ;;  %v631_v52 = vpack.c.bf16 %v605_v50, %v603_v49  ;;  %v623_v3 = vpop.f32.mrf.mxu3 }
 0x107   : > { %717 = vmatmul.bf16.gmra.mxu1 %v629_v46 }
 0x10b   : > { %v615_v57 = vpop.f32.mrf.mxu2 }
 0x10c   : > { %v633_v59 = vpack.c.bf16 %v615_v57, %v613_v56 }
 0x10d   : > { %v625_v6 = vpop.f32.mrf.mxu3 }
 0x10e   : > { %v635_v7 = vpack.c.bf16 %v625_v6, %v623_v3 }
 0x117   : > { %722 = vmatmul.bf16.gmra.mxu1 %v630_v48 }
 0x127   : > { %727 = vmatmul.bf16.gmra.mxu1 %v631_v52 }
 0x137   : > { %732 = vmatmul.bf16.gmra.mxu1 %v632_v54  ;;  %v1634_v54 = vld [vmem:[#allocation10 + $0x28] sm:$0xff] }
 0x138   : > { %1041 = vmatpush.bf16.msrb.mxu3 %v1634_v54 }
 0x13c   : > { %1042 = vmatpush.bf16.msrb.mxu3 %v1633_v58 }
 0x140   : > { %1043 = vmatpush.bf16.msrb.mxu3 %v1632_v63 }
 0x144   : > { %1044 = vmatpush.bf16.msrb.mxu3 %v1631_v0 }
 0x147   : > { %737 = vmatmul.bf16.gmra.mxu1 %v633_v59 }
 0x148   : > { %1045 = vmatpush.bf16.msrb.mxu3 %v1630_v4 }
 0x157   : > { %742 = vmatmul.bf16.gmra.mxu1 %v634_v1 }
 0x167   : > { %747 = vmatmul.bf16.gmra.mxu1 %v635_v7 }
 0x174   : > { %v713_v8 = vpop.f32.mrf.mxu1 }
 0x175   : > { %v714_v10 = vadd.f32 %v2361_v9, %v713_v8  ;;  %v1629_v8 = vld [vmem:[#allocation10] sm:$0xff] }
 0x176   : > { %1046 = vmatpush.bf16.msrb.mxu3 %v1629_v8  ;;  %v1682_v8 = vld [vmem:[#allocation5 + $0x28] sm:$0xff]  }
 0x177   : > { %v753_v13 = vmax.f32 %v714_v10, 0.0 }
 0x17c   : > { %v715_v11 = vpop.f32.mrf.mxu1 }
 0x17d   : > { %v716_v12 = vadd.f32 %v2361_v9, %v715_v11  ;;  %v2382_v11 = vld [vmem:[%s2516_s11] ss:$0 sm:$0xff]  ;;  %s2022_s11 = sshra.s32 %s1279_s23, 4  ;;  %s2023_s11 = int_to_ptr.hbm [resolvable:$true] %s2022_s11 }
 0x17e   : > { %s2024_s10 = scalar_lea.hbm %s2023_s11, 128  ;;  %p2029_p5 = scmp.lt.s32.totalorder %s2023_s11, %s2520_s9 }
 0x17f   : > { %v754_v14 = vmax.f32 %v716_v12, 0.0  ;;  %p2025_p1 = scmp.ne.s32.totalorder %s2023_s11, %s2024_s10  ;;  %p2030_p7 = scmp.lt.s32.totalorder %s2028_s29, %s2024_s10 }
 0x181   : > { %v769_v15 = vpack.c.bf16 %v754_v14, %v753_v13  ;;  %v1647_v13 = vld [vmem:[#allocation5] sm:$0xff]   ;;  %p2026_p4 = pnand %p2025_p1, %p2294_p0  ;;  %p2031_p9 = por %p2030_p7, %p2029_p5 }
 0x183   : > { %853 = vmatmul.bf16.vlgmr.msrb.gmra.mxu2 %v769_v15  ;;  %p2027_p8 = pneg %p2026_p4 }
 0x184   : > { %v718_v16 = vpop.f32.mrf.mxu1 }
 0x185   : > { %v719_v17 = vadd.f32 %v2361_v9, %v718_v16  ;;  %p2032_p6 = pnand %p2031_p9, %p2027_p8 }
 0x187   : > { %v755_v20 = vmax.f32 %v719_v17, 0.0  ;;  %v1649_v17 = vunpack.c.h.bf16 %v1647_v13 }
 0x18c   : > { %v720_v18 = vpop.f32.mrf.mxu1 }
 0x18d   : > { %v721_v19 = vadd.f32 %v2361_v9, %v720_v18 }
 0x18f   : > { %v756_v21 = vmax.f32 %v721_v19, 0.0 }
 0x191   : > { %v770_v22 = vpack.c.bf16 %v756_v21, %v755_v20 }
 0x193   : > { %858 = vmatmul.bf16.gmra.mxu2 %v770_v22 }
 0x194   : > { %v723_v23 = vpop.f32.mrf.mxu1 }
 0x195   : > { %v724_v24 = vadd.f32 %v2361_v9, %v723_v23 }
 0x197   : > { %v757_v27 = vmax.f32 %v724_v24, 0.0  ;;  %v1678_v24 = vld [vmem:[#allocation5 + $0x8] sm:$0xff]  }
 0x19c   : > { %v725_v25 = vpop.f32.mrf.mxu1 }
 0x19d   : > { %v726_v26 = vadd.f32 %v2361_v9, %v725_v25 }
 0x19f   : > { %v758_v28 = vmax.f32 %v726_v26, 0.0 }
 0x1a1   : > { %v771_v29 = vpack.c.bf16 %v758_v28, %v757_v27  ;;  %v1652_v27 = vunpack.c.l.bf16 %v1678_v24 }
 0x1a3   : > { %863 = vmatmul.bf16.gmra.mxu2 %v771_v29  ;;  %v1653_v29 = vunpack.c.h.bf16 %v1678_v24  ;;  %v1642_v24 = vld [vmem:[#allocation11 + $0x28] sm:$0xff] }
 0x1a4   : > { %v728_v30 = vpop.f32.mrf.mxu1 }
 0x1a5   : > { %v729_v31 = vadd.f32 %v2361_v9, %v728_v30 }
 0x1a7   : > { %v759_v34 = vmax.f32 %v729_v31, 0.0 }
 0x1ac   : > { %v730_v32 = vpop.f32.mrf.mxu1 }
 0x1ad   : > { %v731_v33 = vadd.f32 %v2361_v9, %v730_v32 }
 0x1af   : > { %v760_v35 = vmax.f32 %v731_v33, 0.0 }
 0x1b1   : > { %v772_v36 = vpack.c.bf16 %v760_v35, %v759_v34 }
 0x1b3   : > { %868 = vmatmul.bf16.gmra.mxu2 %v772_v36  ;;  %v1679_v36 = vld [vmem:[#allocation5 + $0x10] sm:$0xff]  }
 0x1b4   : > { %v733_v37 = vpop.f32.mrf.mxu1 }
 0x1b5   : > { %v734_v38 = vadd.f32 %v2361_v9, %v733_v37 }
 0x1b7   : > { %v761_v41 = vmax.f32 %v734_v38, 0.0 }
 0x1bc   : > { %v735_v39 = vpop.f32.mrf.mxu1 }
 0x1bd   : > { %v736_v40 = vadd.f32 %v2361_v9, %v735_v39  ;;  %v1656_v39 = vunpack.c.l.bf16 %v1679_v36 }
 0x1bf   : > { %v762_v42 = vmax.f32 %v736_v40, 0.0 }
 0x1c1   : > { %v773_v43 = vpack.c.bf16 %v762_v42, %v761_v41  ;;  %v1657_v41 = vunpack.c.h.bf16 %v1679_v36 }
 0x1c3   : > { %873 = vmatmul.bf16.gmra.mxu2 %v773_v43 }
 0x1c4   : > { %v738_v44 = vpop.f32.mrf.mxu1 }
 0x1c5   : > { %v739_v45 = vadd.f32 %v2361_v9, %v738_v44 }
 0x1c7   : > { %v763_v48 = vmax.f32 %v739_v45, 0.0 }
 0x1cc   : > { %v740_v46 = vpop.f32.mrf.mxu1 }
 0x1cd   : > { %v741_v47 = vadd.f32 %v2361_v9, %v740_v46 }
 0x1cf   : > { %v764_v49 = vmax.f32 %v741_v47, 0.0 }
 0x1d1   : > { %v774_v50 = vpack.c.bf16 %v764_v49, %v763_v48  ;;  %v1680_v48 = vld [vmem:[#allocation5 + $0x18] sm:$0xff]  }
 0x1d2   : > { %v1660_v51 = vunpack.c.l.bf16 %v1680_v48  ;;  %v1661_v53 = vunpack.c.h.bf16 %v1680_v48 }
 0x1d3   : > { %878 = vmatmul.bf16.gmra.mxu2 %v774_v50 }
 0x1d4   : > { %v743_v52 = vpop.f32.mrf.mxu1 }
 0x1d5   : > { %v744_v55 = vadd.f32 %v2361_v9, %v743_v52 }
 0x1d7   : > { %v765_v59 = vmax.f32 %v744_v55, 0.0 }
 0x1dc   : > { %v745_v56 = vpop.f32.mrf.mxu1 }
 0x1dd   : > { %v746_v57 = vadd.f32 %v2361_v9, %v745_v56 }
 0x1df   : > { %v766_v60 = vmax.f32 %v746_v57, 0.0 }
 0x1e1   : > { %v775_v61 = vpack.c.bf16 %v766_v60, %v765_v59  ;;  %v1681_v60 = vld [vmem:[#allocation5 + $0x20] sm:$0xff]  }
 0x1e2   : > { %v1664_v63 = vunpack.c.l.bf16 %v1681_v60 }
 0x1e3   : > { %883 = vmatmul.bf16.gmra.mxu2 %v775_v61 }
 0x1e4   : > { %v748_v62 = vpop.f32.mrf.mxu1 }
 0x1e5   : > { %v749_v1 = vadd.f32 %v2361_v9, %v748_v62 }
 0x1e7   : > { %v767_v5 = vmax.f32 %v749_v1, 0.0  ;;  %v1665_v1 = vunpack.c.h.bf16 %v1681_v60 }
 0x1ec   : > { %v750_v2 = vpop.f32.mrf.mxu1 }
 0x1ed   : > { %v751_v3 = vadd.f32 %v2361_v9, %v750_v2  ;;  %v1648_v9 = vunpack.c.l.bf16 %v1647_v13  ;;  %v1668_v13 = vunpack.c.l.bf16 %v1682_v8 }
 0x1ef   : > { %v768_v6 = vmax.f32 %v751_v3, 0.0 }
 0x1f1   : > { %v776_v7 = vpack.c.bf16 %v768_v6, %v767_v5 }
 0x1f3   : > { %888 = vmatmul.bf16.gmra.mxu2 %v776_v7 }
 0x206   : > { %v854_v10 = vpop.f32.mrf.mxu2 }
 0x207   : > { %v855_v12 = vadd.f32 %v2382_v11, %v854_v10 }
 0x209   : > { %v894_v15 = vmax.f32 %v855_v12, 0.0 }
 0x20b   : > { %v947_v19 = vadd.f32 %v1648_v9, %v894_v15  ;;  %v1669_v15 = vunpack.c.h.bf16 %v1682_v8 }
 0x20e   : > { %v856_v14 = vpop.f32.mrf.mxu2 }
 0x20f   : > { %v857_v16 = vadd.f32 %v2382_v11, %v856_v14 }
 0x211   : > { %v895_v18 = vmax.f32 %v857_v16, 0.0 }
 0x213   : > { %v948_v20 = vadd.f32 %v1649_v17, %v895_v18 }
 0x215   : > { %v963_v21 = vpack.c.bf16 %v948_v20, %v947_v19  ;;  %v1644_v20 = vld [vmem:[#allocation11 + $0x38] sm:$0xff] }
 0x216   : > { %v859_v22 = vpop.f32.mrf.mxu2  ;;  %1180 = vmatpush.bf16.msrb.mxu0 %v1644_v20 }
 0x217   : > { %1047 = vmatmul.bf16.vlgmr.msrb.gmra.mxu3 %v963_v21  ;;  %v860_v23 = vadd.f32 %v2382_v11, %v859_v22  ;;  %v1643_v21 = vld [vmem:[#allocation11 + $0x30] sm:$0xff] }
 0x219   : > { %v896_v26 = vmax.f32 %v860_v23, 0.0  ;;  %v1683_v23 = vld [vmem:[#allocation5 + $0x30] sm:$0xff]  }
 0x21a   : > { %1181 = vmatpush.bf16.msrb.mxu0 %v1643_v21 }
 0x21b   : > { %v949_v31 = vadd.f32 %v1652_v27, %v896_v26  ;;  %v1672_v27 = vunpack.c.l.bf16 %v1683_v23 }
 0x21e   : > { %v861_v25 = vpop.f32.mrf.mxu2  ;;  %1182 = vmatpush.bf16.msrb.mxu0 %v1642_v24 }
 0x21f   : > { %v862_v28 = vadd.f32 %v2382_v11, %v861_v25 }
 0x221   : > { %v897_v30 = vmax.f32 %v862_v28, 0.0 }
 0x223   : > { %v950_v32 = vadd.f32 %v1653_v29, %v897_v30  ;;  %v1673_v29 = vunpack.c.h.bf16 %v1683_v23 }
 0x225   : > { %v964_v33 = vpack.c.bf16 %v950_v32, %v949_v31  ;;  %v1641_v31 = vld [vmem:[#allocation11 + $0x20] sm:$0xff] }
 0x226   : > { %v864_v34 = vpop.f32.mrf.mxu2  ;;  %1183 = vmatpush.bf16.msrb.mxu0 %v1641_v31 }
 0x227   : > { %1052 = vmatmul.bf16.gmra.mxu3 %v964_v33  ;;  %v865_v35 = vadd.f32 %v2382_v11, %v864_v34 }
 0x229   : > { %v898_v38 = vmax.f32 %v865_v35, 0.0  ;;  %v1640_v35 = vld [vmem:[#allocation11 + $0x18] sm:$0xff] }
 0x22a   : > { %1184 = vmatpush.bf16.msrb.mxu0 %v1640_v35 }
 0x22b   : > { %v951_v43 = vadd.f32 %v1656_v39, %v898_v38  ;;  %v1684_v38 = vld [vmem:[#allocation5 + $0x38] sm:$0xff]   ;;  %v1639_v39 = vld [vmem:[#allocation11 + $0x10] sm:$0xff] }
 0x22e   : > { %v866_v37 = vpop.f32.mrf.mxu2  ;;  %1185 = vmatpush.bf16.msrb.mxu0 %v1639_v39 }
 0x22f   : > { %v867_v40 = vadd.f32 %v2382_v11, %v866_v37 }
 0x231   : > { %v899_v42 = vmax.f32 %v867_v40, 0.0 }
 0x233   : > { %v952_v44 = vadd.f32 %v1657_v41, %v899_v42  ;;  %v1638_v41 = vld [vmem:[#allocation11 + $0x8] sm:$0xff] }
 0x234   : > { %1186 = vmatpush.bf16.msrb.mxu0 %v1638_v41 }
 0x235   : > { %v965_v45 = vpack.c.bf16 %v952_v44, %v951_v43  ;;  %v1676_v43 = vunpack.c.l.bf16 %v1684_v38 }
 0x236   : > { %v869_v46 = vpop.f32.mrf.mxu2 }
 0x237   : > { %1057 = vmatmul.bf16.gmra.mxu3 %v965_v45  ;;  %v870_v47 = vadd.f32 %v2382_v11, %v869_v46  ;;  %v1677_v45 = vunpack.c.h.bf16 %v1684_v38 }
 0x239   : > { %v900_v50 = vmax.f32 %v870_v47, 0.0 }
 0x23b   : > { %v953_v55 = vadd.f32 %v1660_v51, %v900_v50 }
 0x23e   : > { %v871_v49 = vpop.f32.mrf.mxu2 }
 0x23f   : > { %v872_v52 = vadd.f32 %v2382_v11, %v871_v49  ;;  %v1637_v49 = vld [vmem:[#allocation11] sm:$0xff] }
 0x240   : > { %1187 = vmatpush.bf16.msrb.mxu0 %v1637_v49 }
 0x241   : > { %v901_v54 = vmax.f32 %v872_v52, 0.0  ;;  %v1826_v52 = vld [vmem:[%s2517_s19] ss:$0 sm:$0xff] }
 0x243   : > { %v954_v56 = vadd.f32 %v1661_v53, %v901_v54 }
 0x245   : > { %v966_v57 = vpack.c.bf16 %v954_v56, %v953_v55 }
 0x246   : > { %v874_v58 = vpop.f32.mrf.mxu2 }
 0x247   : > { %1062 = vmatmul.bf16.gmra.mxu3 %v966_v57  ;;  %v875_v59 = vadd.f32 %v2382_v11, %v874_v58 }
 0x249   : > { %v902_v62 = vmax.f32 %v875_v59, 0.0 }
 0x24b   : > { %v955_v3 = vadd.f32 %v1664_v63, %v902_v62 }
 0x24e   : > { %v876_v61 = vpop.f32.mrf.mxu2 }
 0x24f   : > { %v877_v0 = vadd.f32 %v2382_v11, %v876_v61 }
 0x251   : > { %v903_v2 = vmax.f32 %v877_v0, 0.0 }
 0x253   : > { %v956_v4 = vadd.f32 %v1665_v1, %v903_v2 }
 0x255   : > { %v967_v5 = vpack.c.bf16 %v956_v4, %v955_v3 }
 0x256   : > { %v879_v6 = vpop.f32.mrf.mxu2 }
 0x257   : > { %1067 = vmatmul.bf16.gmra.mxu3 %v967_v5  ;;  %v880_v7 = vadd.f32 %v2382_v11, %v879_v6 }
 0x259   : > { %v904_v12 = vmax.f32 %v880_v7, 0.0 }
 0x25b   : > { %v957_v16 = vadd.f32 %v1668_v13, %v904_v12 }
 0x25e   : > { %v881_v10 = vpop.f32.mrf.mxu2 }
 0x25f   : > { %v882_v14 = vadd.f32 %v2382_v11, %v881_v10 }
 0x261   : > { %v905_v9 = vmax.f32 %v882_v14, 0.0 }
 0x263   : > { %v958_v17 = vadd.f32 %v1669_v15, %v905_v9 }
 0x265   : > { %v968_v18 = vpack.c.bf16 %v958_v17, %v957_v16 }
 0x266   : > { %v884_v19 = vpop.f32.mrf.mxu2 }
 0x267   : > { %1072 = vmatmul.bf16.gmra.mxu3 %v968_v18  ;;  %v885_v22 = vadd.f32 %v2382_v11, %v884_v19 }
 0x269   : > { %v906_v26 = vmax.f32 %v885_v22, 0.0 }
 0x26b   : > { %v959_v32 = vadd.f32 %v1672_v27, %v906_v26 }
 0x26e   : > { %v886_v25 = vpop.f32.mrf.mxu2 }
 0x26f   : > { %v887_v28 = vadd.f32 %v2382_v11, %v886_v25 }
 0x271   : > { %v907_v30 = vmax.f32 %v887_v28, 0.0 }
 0x273   : > { %v960_v33 = vadd.f32 %v1673_v29, %v907_v30 }
 0x275   : > { %v969_v34 = vpack.c.bf16 %v960_v33, %v959_v32 }
 0x276   : > { %v889_v36 = vpop.f32.mrf.mxu2 }
 0x277   : > { %1077 = vmatmul.bf16.gmra.mxu3 %v969_v34  ;;  %v890_v37 = vadd.f32 %v2382_v11, %v889_v36 }
 0x279   : > { %v908_v42 = vmax.f32 %v890_v37, 0.0 }
 0x27b   : > { %v961_v47 = vadd.f32 %v1676_v43, %v908_v42 }
 0x27e   : > { %v891_v40 = vpop.f32.mrf.mxu2 }
 0x27f   : > { %v892_v44 = vadd.f32 %v2382_v11, %v891_v40 }
 0x281   : > { %v909_v46 = vmax.f32 %v892_v44, 0.0  ;;  %v2406_v44 = vld [vmem:[%s2518_s28] ss:$0 sm:$0xff] }
 0x283   : > { %v962_v48 = vadd.f32 %v1677_v45, %v909_v46 }
 0x285   : > { %v970_v50 = vpack.c.bf16 %v962_v48, %v961_v47 }
 0x287   : > { %1082 = vmatmul.bf16.gmra.mxu3 %v970_v50 }
 0x29a   : > { %v1048_v51 = vpop.f32.mrf.mxu3 }
 0x29b   : > { %v1049_v53 = vadd.f32 %v1826_v52, %v1048_v51 }
 0x29d   : > { %v1088_v56 = vmax.f32 %v1049_v53, 0.0 }
 0x2a2   : > { %v1050_v54 = vpop.f32.mrf.mxu3 }
 0x2a3   : > { %v1051_v55 = vadd.f32 %v1826_v52, %v1050_v54 }
 0x2a5   : > { %v1089_v57 = vmax.f32 %v1051_v55, 0.0 }
 0x2a7   : > { %v1104_v11 = vpack.c.bf16 %v1089_v57, %v1088_v56 }
 0x2a9   : > { %1188 = vmatmul.bf16.vlgmr.msrb.gmra.mxu0 %v1104_v11 }
 0x2aa   : > { %v1053_v58 = vpop.f32.mrf.mxu3 }
 0x2ab   : > { %v1054_v59 = vadd.f32 %v1826_v52, %v1053_v58 }
 0x2ad   : > { %v1090_v62 = vmax.f32 %v1054_v59, 0.0 }
 0x2b2   : > { %v1055_v60 = vpop.f32.mrf.mxu3 }
 0x2b3   : > { %v1056_v61 = vadd.f32 %v1826_v52, %v1055_v60 }
 0x2b5   : > { %v1091_v63 = vmax.f32 %v1056_v61, 0.0 }
 0x2b7   : > { %v1105_v0 = vpack.c.bf16 %v1091_v63, %v1090_v62 }
 0x2b9   : > { %1193 = vmatmul.bf16.gmra.mxu0 %v1105_v0 }
 0x2ba   : > { %v1058_v1 = vpop.f32.mrf.mxu3 }
 0x2bb   : > { %v1059_v2 = vadd.f32 %v1826_v52, %v1058_v1 }
 0x2bd   : > { %v1092_v5 = vmax.f32 %v1059_v2, 0.0 }
 0x2c2   : > { %v1060_v3 = vpop.f32.mrf.mxu3 }
 0x2c3   : > { %v1061_v4 = vadd.f32 %v1826_v52, %v1060_v3 }
 0x2c5   : > { %v1093_v6 = vmax.f32 %v1061_v4, 0.0 }
 0x2c7   : > { %v1106_v7 = vpack.c.bf16 %v1093_v6, %v1092_v5 }
 0x2c9   : > { %1198 = vmatmul.bf16.gmra.mxu0 %v1106_v7 }
 0x2ca   : > { %v1063_v8 = vpop.f32.mrf.mxu3 }
 0x2cb   : > { %v1064_v10 = vadd.f32 %v1826_v52, %v1063_v8 }
 0x2cd   : > { %v1094_v14 = vmax.f32 %v1064_v10, 0.0 }
 0x2d2   : > { %v1065_v12 = vpop.f32.mrf.mxu3 }
 0x2d3   : > { %v1066_v13 = vadd.f32 %v1826_v52, %v1065_v12 }
 0x2d5   : > { %v1095_v15 = vmax.f32 %v1066_v13, 0.0 }
 0x2d7   : > { %v1107_v9 = vpack.c.bf16 %v1095_v15, %v1094_v14 }
 0x2d9   : > { %1203 = vmatmul.bf16.gmra.mxu0 %v1107_v9 }
 0x2da   : > { %v1068_v16 = vpop.f32.mrf.mxu3 }
 0x2db   : > { %v1069_v17 = vadd.f32 %v1826_v52, %v1068_v16 }
 0x2dd   : > { %v1096_v20 = vmax.f32 %v1069_v17, 0.0 }
 0x2e2   : > { %v1070_v18 = vpop.f32.mrf.mxu3 }
 0x2e3   : > { %v1071_v19 = vadd.f32 %v1826_v52, %v1070_v18 }
 0x2e5   : > { %v1097_v21 = vmax.f32 %v1071_v19, 0.0 }
 0x2e7   : > { %v1108_v22 = vpack.c.bf16 %v1097_v21, %v1096_v20 }
 0x2e9   : > { %1208 = vmatmul.bf16.gmra.mxu0 %v1108_v22 }
 0x2ea   : > { %v1073_v23 = vpop.f32.mrf.mxu3 }
 0x2eb   : > { %v1074_v24 = vadd.f32 %v1826_v52, %v1073_v23 }
 0x2ed   : > { %v1098_v27 = vmax.f32 %v1074_v24, 0.0 }
 0x2f2   : > { %v1075_v25 = vpop.f32.mrf.mxu3 }
 0x2f3   : > { %v1076_v26 = vadd.f32 %v1826_v52, %v1075_v25 }
 0x2f5   : > { %v1099_v28 = vmax.f32 %v1076_v26, 0.0 }
 0x2f7   : > { %v1109_v29 = vpack.c.bf16 %v1099_v28, %v1098_v27 }
 0x2f9   : > { %1213 = vmatmul.bf16.gmra.mxu0 %v1109_v29 }
 0x2fa   : > { %v1078_v30 = vpop.f32.mrf.mxu3 }
 0x2fb   : > { %v1079_v31 = vadd.f32 %v1826_v52, %v1078_v30 }
 0x2fd   : > { %v1100_v34 = vmax.f32 %v1079_v31, 0.0 }
 0x302   : > { %v1080_v32 = vpop.f32.mrf.mxu3 }
 0x303   : > { %v1081_v33 = vadd.f32 %v1826_v52, %v1080_v32 }
 0x305   : > { %v1101_v35 = vmax.f32 %v1081_v33, 0.0 }
 0x307   : > { %v1110_v36 = vpack.c.bf16 %v1101_v35, %v1100_v34 }
 0x309   : > { %1218 = vmatmul.bf16.gmra.mxu0 %v1110_v36 }
 0x30a   : > { %v1083_v37 = vpop.f32.mrf.mxu3 }
 0x30b   : > { %v1084_v38 = vadd.f32 %v1826_v52, %v1083_v37 }
 0x30d   : > { %v1102_v41 = vmax.f32 %v1084_v38, 0.0 }
 0x312   : > { %v1085_v39 = vpop.f32.mrf.mxu3 }
 0x313   : > { %v1086_v40 = vadd.f32 %v1826_v52, %v1085_v39 }
 0x315   : > { %v1103_v42 = vmax.f32 %v1086_v40, 0.0 }
 0x317   : > { %v1111_v43 = vpack.c.bf16 %v1103_v42, %v1102_v41 }
 0x319   : > { %1223 = vmatmul.bf16.gmra.mxu0 %v1111_v43 }
 0x326   : > { %v1189_v45 = vpop.f32.mrf.mxu0 }
 0x327   : > { %v1190_v46 = vadd.f32 %v2406_v44, %v1189_v45 }
 0x329   : > { %v1229_v47 = vmax.f32 %v1190_v46, 0.0 }
 0x32b   : > { %1245 = vst [vmem:[%s2411_s22] sm:$0xff] %v1229_v47 }
 0x32e   : > { %v1191_v48 = vpop.f32.mrf.mxu0 }
 0x32f   : > { %v1192_v49 = vadd.f32 %v2406_v44, %v1191_v48 }
 0x331   : > { %v1230_v50 = vmax.f32 %v1192_v49, 0.0 }
 0x333   : > { %1246 = vst [vmem:[%s2411_s22 + $0x8] sm:$0xff] %v1230_v50 }
 0x336   : > { %v1194_v51 = vpop.f32.mrf.mxu0 }
 0x337   : > { %v1195_v52 = vadd.f32 %v2406_v44, %v1194_v51 }
 0x339   : > { %v1231_v53 = vmax.f32 %v1195_v52, 0.0 }
 0x33b   : > { %1247 = vst [vmem:[%s2411_s22 + $0x10] sm:$0xff] %v1231_v53 }
 0x33e   : > { %v1196_v54 = vpop.f32.mrf.mxu0 }
 0x33f   : > { %v1197_v55 = vadd.f32 %v2406_v44, %v1196_v54 }
 0x341   : > { %v1232_v56 = vmax.f32 %v1197_v55, 0.0 }
 0x343   : > { %1248 = vst [vmem:[%s2411_s22 + $0x18] sm:$0xff] %v1232_v56 }
 0x346   : > { %v1199_v57 = vpop.f32.mrf.mxu0 }
 0x347   : > { %v1200_v11 = vadd.f32 %v2406_v44, %v1199_v57 }
 0x349   : > { %v1233_v58 = vmax.f32 %v1200_v11, 0.0 }
 0x34b   : > { %1249 = vst [vmem:[%s2411_s22 + $0x20] sm:$0xff] %v1233_v58 }
 0x34e   : > { %v1201_v59 = vpop.f32.mrf.mxu0 }
 0x34f   : > { %v1202_v60 = vadd.f32 %v2406_v44, %v1201_v59 }
 0x351   : > { %v1234_v61 = vmax.f32 %v1202_v60, 0.0 }
 0x353   : > { %1250 = vst [vmem:[%s2411_s22 + $0x28] sm:$0xff] %v1234_v61 }
 0x356   : > { %v1204_v62 = vpop.f32.mrf.mxu0 }
 0x357   : > { %v1205_v63 = vadd.f32 %v2406_v44, %v1204_v62 }
 0x359   : > { %v1235_v0 = vmax.f32 %v1205_v63, 0.0 }
 0x35b   : > { %1251 = vst [vmem:[%s2411_s22 + $0x30] sm:$0xff] %v1235_v0 }
 0x35e   : > { %v1206_v1 = vpop.f32.mrf.mxu0 }
 0x35f   : > { %v1207_v2 = vadd.f32 %v2406_v44, %v1206_v1 }
 0x361   : > { %v1236_v3 = vmax.f32 %v1207_v2, 0.0 }
 0x363   : > { %1252 = vst [vmem:[%s2411_s22 + $0x38] sm:$0xff] %v1236_v3 }
 0x366   : > { %v1209_v4 = vpop.f32.mrf.mxu0 }
 0x367   : > { %v1210_v5 = vadd.f32 %v2406_v44, %v1209_v4 }
 0x369   : > { %v1237_v6 = vmax.f32 %v1210_v5, 0.0 }
 0x36b   : > { %1253 = vst [vmem:[%s2411_s22 + $0x40] sm:$0xff] %v1237_v6 }
 0x36e   : > { %v1211_v7 = vpop.f32.mrf.mxu0 }
 0x36f   : > { %v1212_v8 = vadd.f32 %v2406_v44, %v1211_v7 }
 0x371   : > { %v1238_v10 = vmax.f32 %v1212_v8, 0.0 }
 0x373   : > { %1254 = vst [vmem:[%s2411_s22 + $0x48] sm:$0xff] %v1238_v10 }
 0x376   : > { %v1214_v12 = vpop.f32.mrf.mxu0 }
 0x377   : > { %v1215_v13 = vadd.f32 %v2406_v44, %v1214_v12 }
 0x379   : > { %v1239_v14 = vmax.f32 %v1215_v13, 0.0 }
 0x37b   : > { %1255 = vst [vmem:[%s2411_s22 + $0x50] sm:$0xff] %v1239_v14 }
 0x37e   : > { %v1216_v15 = vpop.f32.mrf.mxu0 }
 0x37f   : > { %v1217_v9 = vadd.f32 %v2406_v44, %v1216_v15 }
 0x381   : > { %v1240_v16 = vmax.f32 %v1217_v9, 0.0 }
 0x383   : > { %1256 = vst [vmem:[%s2411_s22 + $0x58] sm:$0xff] %v1240_v16 }
 0x386   : > { %v1219_v17 = vpop.f32.mrf.mxu0 }
 0x387   : > { %v1220_v18 = vadd.f32 %v2406_v44, %v1219_v17 }
 0x389   : > { %v1241_v19 = vmax.f32 %v1220_v18, 0.0 }
 0x38b   : > { %1257 = vst [vmem:[%s2411_s22 + $0x60] sm:$0xff] %v1241_v19 }
 0x38e   : > { %v1221_v20 = vpop.f32.mrf.mxu0 }
 0x38f   : > { %v1222_v21 = vadd.f32 %v2406_v44, %v1221_v20 }
 0x391   : > { %v1242_v22 = vmax.f32 %v1222_v21, 0.0 }
 0x393   : > { %1258 = vst [vmem:[%s2411_s22 + $0x68] sm:$0xff] %v1242_v22 }
 0x396   : > { %v1224_v23 = vpop.f32.mrf.mxu0 }
 0x397   : > { %v1225_v24 = vadd.f32 %v2406_v44, %v1224_v23 }
 0x399   : > { %v1243_v25 = vmax.f32 %v1225_v24, 0.0 }
 0x39b   : > { %1259 = vst [vmem:[%s2411_s22 + $0x70] sm:$0xff] %v1243_v25 }
 0x39e   : > { %v1226_v26 = vpop.f32.mrf.mxu0 }
 0x39f   : > { %v1227_v27 = vadd.f32 %v2406_v44, %v1226_v26 }
 0x3a1   : > { %v1244_v28 = vmax.f32 %v1227_v27, 0.0 }
 0x3a3   : > { %1260 = vst [vmem:[%s2411_s22 + $0x78] sm:$0xff] %v1244_v28 }
 0x3a4   : > { %2035 = shalt.err (!%p2032_p6)
}
 0x3a5   : > { %s2117_s27 = smov 128   ;;  %s2118_s22 = smov 8  }
 0x3a6   : > { %1729 = dma.vmem_to_hbm [thread:$0]  (%p2294_p0), %s1277_s21, 2048, %s1279_s23, %s1262_s26, %s2117_s27, %s2117_s27, %s2118_s22  }
 0x3a7 PF: > { %s2521_s13 = sld [smem:[#allocation20_spill]]  ;;  %p2524_p11 = scmp.ge.s32.totalorder %s2106_s18, 2 }
 0x3a8   : > { %s2522_s24 = sld [smem:[#allocation22_spill]] }
 0x3ad   : > { %s1293_s20 = sand.u32 1, %s2521_s13  }
 0x3ae   : > { %p2523_p10 = scmp.ne.s32.totalorder %s2522_s24, 0  ;;  %s1294_s16 = scalar_lea.sflag [#allocation4], %s1293_s20 }
 0x3b0   : > { %p1752_p13 = pnand %p2524_p11, %p2523_p10 }
 0x3b2   : > { %p1753_p12 = pneg %p1752_p13 }
 0x3b4   : > { %2081 = dma.done.wait (%p1753_p12), %s1294_s16, 2048  }
 0x3b5   : > { %2083 = vsyncadd (%p1753_p12), %s1294_s16, 4294965248  ;;  %s29_s18 = sadd.s32 1, %s2106_s18   ;;  %s2525_s13 = smov %s2090_s14 }
 0x3b6   : > { %p26_p3 = scmp.ge.s32.totalorder %s29_s18, 4   ;;  %s2526_s14 = smov %s2094_s15 }
 0x3b7   : > { %s2527_s15 = smov %s2303_s7  ;;  %s2528_s16 = smov %s2102_s17 }
 0x3b8   : > { %s2529_s17 = smov %s2531_s25  ;;  %28 = sbr.rel (!%p26_p3) target bundleno = 15 (0xf), region = 127 }
 0x3bd   :  { %1300 = vsyncpa [#allocation3], 1 }
 0x3be   :  { %1302 = vsyncpa [#allocation3 + $0x1], 1 }
 0x3bf   :  { %1303 = vsyncpa [#allocation6], 1 }
 0x3c0   :  { %1304 = vsyncpa [#allocation9], 1 }
 0x3c1   :  { %1305 = vsyncpa [#allocation12], 1 }
 0x3c2   :  { %1306 = vsyncpa [#allocation4], 1 }
 0x3c3   :  { %1308 = vsyncpa [#allocation4 + $0x1], 1 }

// kernel: tpu_custom_call.1
= control target key start
LH: loop header
LB: loop body
LE: loop exit
PB: predicated region body
PF: predicated region fallthrough
CT: control target
= control target key end

     0   :  { %s2537_s0 = inlined_call_operand.hbm [shape: f32[2,128,128], index: 0, kind: input, shape index: {}]   ;;  %s2538_s1 = inlined_call_operand.hbm [shape: bf16[2,128,128], index: 1, kind: input, shape index: {}]   ;;  %s2539_s2 = inlined_call_operand.hbm [shape: bf16[128,128], index: 2, kind: input, shape index: {}]   ;;  %s2540_s3 = inlined_call_operand.vmem [shape: f32[1,128], index: 3, kind: input, shape index: {}]   ;;  %s2541_s4 = inlined_call_operand.hbm [shape: bf16[128,128], index: 4, kind: input, shape index: {}]   ;;  %s2542_s5 = inlined_call_operand.vmem [shape: f32[1,128], index: 5, kind: input, shape index: {}]   ;;  %s2543_s6 = inlined_call_operand.hbm [shape: bf16[128,128], index: 6, kind: input, shape index: {}]   ;;  %s2544_s7 = inlined_call_operand.vmem [shape: f32[1,128], index: 7, kind: input, shape index: {}]   ;;  %s2545_s8 = inlined_call_operand.hbm [shape: bf16[128,128], index: 8, kind: input, shape index: {}]   ;;  %s2546_s9 = inlined_call_operand.vmem [shape: f32[1,128], index: 9, kind: input, shape index: {}]   ;;  %s2547_s10 = inlined_call_operand.hbm [shape: f32[2,128,128], index: 10, kind: output, shape index: {}]  }
   0x1   :  { %2558 = sst [smem:[#allocation27_spill]] %s2537_s0 }
   0x2   :  { %2559 = sst [smem:[#allocation28_spill]] %s2539_s2 }
   0x3   :  { %2560 = sst [smem:[#allocation29_spill]] %s2541_s4 }
   0x4   :  { %2561 = sst [smem:[#allocation30_spill]] %s2543_s6 }
   0x5   :  { %2562 = sst [smem:[#allocation31_spill]] %s2545_s8 }
   0x6   :  { %15 = vsyncpa [#allocation3], 0 }
   0x7   :  { %17 = vsyncpa [#allocation3 + $0x1], 0 }
   0x8   :  { %18 = vsyncpa [#allocation6], 0 }
   0x9   :  { %20 = vsyncpa [#allocation6 + $0x1], 0 }
   0xa   :  { %21 = vsyncpa [#allocation9], 0 }
   0xb   :  { %22 = vsyncpa [#allocation12], 0 }
   0xc   :  { %23 = vsyncpa [#allocation4], 0 }
   0xd   :  { %25 = vsyncpa [#allocation4 + $0x1], 0  ;;  %s2202_s13 = smov 0   ;;  %s2204_s14 = smov 0  }
   0xe   :  { %s2206_s15 = smov 0   ;;  %s2208_s16 = smov 0  }
   0xf   :  { %s2210_s17 = smov 0   ;;  %s2212_s18 = smov 0  }
  0x10 LB: > { %2563 = sst [smem:[#allocation20_spill]] %s2115_s13  ;;  %s2233_s19 = sadd.s32 4294967295, %s2135_s18   ;;  %s2135_s18 = sphi %s2212_s18, %s31_s18   ;;  %s2131_s17 = sphi %s2210_s17, %s2594_s17   ;;  %s2127_s16 = sphi %s2208_s16, %s2593_s16   ;;  %s2123_s15 = sphi %s2206_s15, %s2589_s15   ;;  %s2119_s14 = sphi %s2204_s14, %s2592_s14   ;;  %s2115_s13 = sphi %s2202_s13, %s2591_s13  }
  0x11   : > { %2564 = sst [smem:[#allocation21_spill]] %s2123_s15  ;;  %s1447_s20 = sadd.s32 4294967294, %s2135_s18  }
  0x12   : > { %2565 = sst [smem:[#allocation22_spill]] %s2135_s18  ;;  %p65_p0 = scmp.ne.s32.totalorder %s2119_s14, %s2115_s13 }
  0x13   : > { %p66_p1 = scmp.eq.s32.totalorder %s2233_s19, 0  ;;  %p285_p2 = scmp.eq.s32.totalorder %s2233_s19, 1 }
  0x14   : > { %p291_p3 = scmp.eq.s32.totalorder %s1447_s20, 1  ;;  %p1448_p5 = scmp.ge.s32.totalorder %s2135_s18, 1 }
  0x15   : > { %p2242_p4 = por %p66_p1, %p65_p0  ;;  %p298_p7 = scmp.lt.s32.totalorder %s2135_s18, 3 }
  0x16   : > { %p2247_p6 = por %p291_p3, %p65_p0  ;;  %s2569_s2 = sld [smem:[#allocation28_spill]] }
  0x17   : > { %p2255_p8 = pnand %p1448_p5, %p298_p7  ;;  %s2137_s27 = smov [#allocation7]  }
  0x18   : > { %s2567_s22 = scalar_select %p2247_p6, 1, 0 }
  0x19   : > { %p1761_p9 = pneg %p2255_p8  ;;  %s311_s28 = sshll.u32 %s2137_s27, 4  ;;  %s312_s28 = int_to_ptr.vmem [resolvable:$true] %s311_s28 }
  0x1a   : > { %2568 = sst [smem:[#allocation23_spill]] %s2567_s22  ;;  %p1453_p11 = scmp.ge.s32.totalorder %s2135_s18, 2 }
  0x1b   : > { %p2263_p10 = pnand %p1761_p9, %p66_p1  ;;  %s2572_s4 = sld [smem:[#allocation29_spill]] }
  0x1c   : > { %s309_s25 = sshll.u32 %s2569_s2, 4  ;;  %s2550_s20 = smov 64   ;;  %s310_s25 = int_to_ptr.hbm [resolvable:$true] %s309_s25 }
  0x1d   : > { %s2551_s23 = smov 4   ;;  %s2140_s24 = smov [#allocation8]  }
  0x1e   : > { %1764 = dma.hbm_to_vmem [thread:$0]  (!%p2263_p10), %s310_s25, 1024, %s312_s28, [#allocation6], %s2550_s20, %s2550_s20, %s2551_s23  }
  0x1f   : > { %s328_s27 = sshll.u32 %s2140_s24, 4  ;;  %s2573_s6 = sld [smem:[#allocation30_spill]]  ;;  %s329_s27 = int_to_ptr.vmem [resolvable:$true] %s328_s27 }
  0x20   : > { %s2574_s8 = sld [smem:[#allocation31_spill]]  ;;  %s2141_s11 = smov [#allocation10]  }
  0x21   : > { %s326_s12 = sshll.u32 %s2572_s4, 4  ;;  %s345_s24 = sshll.u32 %s2141_s11, 4  ;;  %s327_s12 = int_to_ptr.hbm [resolvable:$true] %s326_s12  ;;  %s346_s24 = int_to_ptr.vmem [resolvable:$true] %s345_s24 }
  0x22   : > { %1767 = dma.hbm_to_vmem [thread:$0]  (!%p2263_p10), %s327_s12, 1024, %s329_s27, [#allocation9], %s2550_s20, %s2550_s20, %s2551_s23  }
  0x23   : > { %s2142_s2 = smov [#allocation11]   ;;  %s43_s12 = sadd.s32 1, %s2131_s17 }
  0x24   : > { %s362_s22 = sshll.u32 %s2142_s2, 4  ;;  %s52_s27 = sadd.s32 1, %s2123_s15  ;;  %s363_s22 = int_to_ptr.vmem [resolvable:$true] %s362_s22 }
  0x25   : > { %s343_s13 = sshll.u32 %s2573_s6, 4  ;;  %p45_p12 = scmp.ge.s32.totalorder %s43_s12, 2  ;;  %s344_s13 = int_to_ptr.hbm [resolvable:$true] %s343_s13 }
  0x26   : > { %s360_s30 = sshll.u32 %s2574_s8, 4  ;;  %p59_p13 = scmp.ne.s32.totalorder %s2123_s15, %s2119_s14  ;;  %s361_s30 = int_to_ptr.hbm [resolvable:$true] %s360_s30 }
  0x27   : > { %1770 = dma.hbm_to_vmem [thread:$0]  (!%p2263_p10), %s344_s13, 1024, %s346_s24, [#allocation9], %s2550_s20, %s2550_s20, %s2551_s23  }
  0x28   : > { %1773 = dma.hbm_to_vmem [thread:$0]  (!%p2263_p10), %s361_s30, 1024, %s363_s22, [#allocation12], %s2550_s20, %s2550_s20, %s2551_s23  }
  0x29   : > { %p60_p0 = scmp.eq.s32.totalorder %s2135_s18, 0  ;;  %p1789_p3 = scmp.lt.s32.totalorder %s2135_s18, 2 }
  0x2a   : > { %s2596_s12 = smov (%p45_p12, %s43_s12), 0  ;;  %p2311_p7 = por %p285_p2, %p59_p13 }
  0x2b   : > { %2575 = sst [smem:[#allocation24_spill]] %s2596_s12  ;;  %p2305_p5 = por %p60_p0, %p59_p13 }
  0x2c   : > { %s2577_s29 = scalar_select %p2311_p7, 1, 0 }
  0x2d   : > { %s47_s25 = ssub.s32 %s2131_s17, %s2596_s12  ;;  %s379_s28 = sand.u32 1, %s2123_s15  }
  0x2e   : > { %2578 = sst [smem:[#allocation25_spill]] %s2577_s29  ;;  %p50_p9 = scmp.eq.s32.totalorder %s47_s25, 0 }
  0x2f   : > { %s1454_s30 = sshll.u32 %s379_s28, 7  ;;  %s1633_s11 = sshll.u32 %s2131_s17, 7 }
  0x30   : > { %s2320_s24 = scalar_select %p50_p9, %s2123_s15, %s52_s27  }
  0x31   : > { %s2580_s0 = sld [smem:[#allocation27_spill]]  ;;  %s383_s4 = scalar_lea.vmem [#allocation2], %s1454_s30 }
  0x32   : > { %2579 = sst [smem:[#allocation26_spill]] %s2320_s24  ;;  %s393_s6 = sshll.u32 %s383_s4, 4  ;;  %s394_s6 = int_to_ptr.vmem [resolvable:$true] %s393_s6 }
  0x33   : > { %p2329_p2 = pnand %p1789_p3, %p2305_p5  ;;  %s403_s25 = sand.u32 1, %s2135_s18  }
  0x34   : > { %s380_s27 = scalar_lea.sflag [#allocation3], %s379_s28  ;;  %s2143_s12 = smov 128  }
  0x35   : > { %s2144_s24 = smov 8   ;;  %s404_s15 = scalar_lea.sflag [#allocation6], %s403_s25 }
  0x36   : > { %s2582_s29 = smov 4   ;;  %s2583_s18 = smov 64  }
  0x37   : > { %s390_s20 = scalar_lea.hbm %s2580_s0, %s1633_s11  ;;  %s1457_s11 = sshll.u32 %s379_s28, 6 }
  0x38   : > { %s391_s23 = sshll.u32 %s390_s20, 4  ;;  %s1634_s20 = sshll.u32 %s2131_s17, 6  ;;  %s392_s23 = int_to_ptr.hbm [resolvable:$true] %s391_s23 }
  0x39   : > { %1777 = dma.hbm_to_vmem [thread:$0]  (!%p2329_p2), %s392_s23, 2048, %s394_s6, %s380_s27, %s2143_s12, %s2143_s12, %s2144_s24  }
  0x3a   : > { %s412_s2 = scalar_lea.hbm %s2538_s1, %s1634_s20  ;;  %s407_s22 = scalar_lea.vmem [#allocation5], %s1457_s11 }
  0x3b   : > { %s413_s13 = sshll.u32 %s412_s2, 4  ;;  %s415_s0 = sshll.u32 %s407_s22, 4  ;;  %s414_s13 = int_to_ptr.hbm [resolvable:$true] %s413_s13  ;;  %s416_s0 = int_to_ptr.vmem [resolvable:$true] %s415_s0 }
  0x3c   : > { %1780 = dma.hbm_to_vmem [thread:$0]  (!%p2329_p2), %s414_s13, 1024, %s416_s0, %s404_s15, %s2583_s18, %s2583_s18, %s2582_s29  }
  0x3d   : > { %427 = sbr.rel (%p2255_p8) target bundleno = 932 (0x3a4), region = 60  ;;  %s2348_s6 = sand.u32 (!%p2255_p8), 1, %s2119_s14  }
  0x3e   : > { %s1461_s23 = sshll.u32 (!%p2255_p8), %s2348_s6, 7  ;;  %s430_s12 = scalar_lea.sflag (!%p2255_p8), [#allocation3], %s2348_s6 }
  0x3f   : > { %s2354_s28 = scalar_lea.vmem (!%p2255_p8), [#allocation2], %s1461_s23 }
  0x42   : > { %2090 = dma.done.wait (%p2242_p4), %s430_s12, 2048  }
  0x43   : > { %2092 = vsyncadd (%p2242_p4), %s430_s12, 4294965248  ;;  %s439_s0 = sand.u32 1, %s2233_s19   ;;  %s1462_s8 = sshll.u32 %s2348_s6, 6 }
  0x44   : > { %s440_s15 = scalar_lea.sflag [#allocation6], %s439_s0  ;;  %s2362_s18 = scalar_lea.vmem [#allocation5], %s1462_s8 }
  0x45   : > { %2094 = dma.done.wait (%p2242_p4), %s440_s15, 1024  }
  0x46   : > { %2096 = vsyncadd (%p2242_p4), %s440_s15, 4294966272 }
  0x47   : > { %2098 = dma.done.wait (%p66_p1), [#allocation6], 1024  }
  0x48   : > { %2100 = vsyncadd (%p66_p1), [#allocation6], 4294966272 }
  0x49   : > { %2102 = dma.done.wait (%p66_p1), [#allocation9], 2048  }
  0x4a   : > { %2104 = vsyncadd (%p66_p1), [#allocation9], 4294965248 }
  0x4b   : > { %2106 = dma.done.wait (%p66_p1), [#allocation12], 1024  }
  0x4c   : > { %2108 = vsyncadd (%p66_p1), [#allocation12], 4294966272  ;;  %v1642_v0 = vld [vmem:[%s2362_s18 + $0x38] sm:$0xff]  ;;  %v1641_v1 = vld [vmem:[%s2362_s18 + $0x30] sm:$0xff]  ;;  %s2465_s20 = scalar_lea.vmem [#allocation13], %s1461_s23  ;;  %s1675_s30 = sshll.u32 %s2127_s16, 7 }
  0x4d   : > { %596 = vmatpush.bf16.msra.mxu0 %v1642_v0  ;;  %1715 = vmatpush.bf16.msra.mxu1 %v1642_v0  ;;  %v1640_v2 = vld [vmem:[%s2362_s18 + $0x28] sm:$0xff]  ;;  %v1639_v3 = vld [vmem:[%s2362_s18 + $0x20] sm:$0xff]  ;;  %v1638_v4 = vld [vmem:[%s2362_s18 + $0x18] sm:$0xff]  ;;  %s1292_s22 = scalar_lea.hbm %s2547_s10, %s1675_s30  ;;  %s1293_s23 = sshll.u32 %s2465_s20, 4  ;;  %s1294_s23 = int_to_ptr.vmem [resolvable:$true] %s1293_s23 }
  0x4e   : > { %1716 = vmatpush.bf16.msra.mxu2 %v1642_v0  ;;  %1717 = vmatpush.bf16.msra.mxu3 %v1642_v0  ;;  %v1637_v5 = vld [vmem:[%s2362_s18 + $0x10] sm:$0xff]  ;;  %v1636_v6 = vld [vmem:[%s2362_s18 + $0x8] sm:$0xff]  ;;  %v1635_v7 = vld [vmem:[%s2362_s18] sm:$0xff]  ;;  %s1295_s12 = sshll.u32 %s1292_s22, 4  ;;  %s1296_s12 = int_to_ptr.hbm [resolvable:$true] %s1295_s12 }
  0x4f   : > { %v508_v8 = vld [vmem:[%s2354_s28] sm:$0xff]  ;;  %v509_v9 = vld [vmem:[%s2354_s28 + $0x8] sm:$0xff]  ;;  %v1650_v16 = vld [vmem:[#allocation7 + $0x38] sm:$0xff]  ;;  %s2051_s0 = sshra.s32 %s1296_s12, 4  ;;  %s2052_s0 = int_to_ptr.hbm [resolvable:$true] %s2051_s0 }
  0x50   : > { %v512_v10 = vld [vmem:[%s2354_s28 + $0x20] sm:$0xff]  ;;  %v513_v11 = vld [vmem:[%s2354_s28 + $0x28] sm:$0xff]  ;;  %v524_v17 = vpack.c.bf16 %v509_v9, %v508_v8  ;;  %v1649_v21 = vld [vmem:[#allocation7 + $0x30] sm:$0xff]  ;;  %s2053_s16 = scalar_lea.hbm %s2052_s0, 128  ;;  %p2058_p10 = scmp.lt.s32.totalorder %s2052_s0, %s2547_s10 }
  0x51   : > { %597 = vmatpush.bf16.msra.mxu0 %v1641_v1  ;;  %1718 = vmatpush.bf16.msra.mxu1 %v1641_v1  ;;  %v516_v12 = vld [vmem:[%s2354_s28 + $0x40] sm:$0xff]  ;;  %v517_v13 = vld [vmem:[%s2354_s28 + $0x48] sm:$0xff]  ;;  %v526_v18 = vpack.c.bf16 %v513_v11, %v512_v10  ;;  %v510_v24 = vld [vmem:[%s2354_s28 + $0x10] sm:$0xff]  ;;  %p2054_p1 = scmp.ne.s32.totalorder %s2052_s0, %s2053_s16 }
  0x52   : > { %1719 = vmatpush.bf16.msra.mxu2 %v1641_v1  ;;  %1720 = vmatpush.bf16.msra.mxu3 %v1641_v1  ;;  %v520_v14 = vld [vmem:[%s2354_s28 + $0x60] sm:$0xff]  ;;  %v521_v15 = vld [vmem:[%s2354_s28 + $0x68] sm:$0xff]  ;;  %v528_v19 = vpack.c.bf16 %v517_v13, %v516_v12  ;;  %v511_v25 = vld [vmem:[%s2354_s28 + $0x18] sm:$0xff] }
  0x53   : > { %v530_v20 = vpack.c.bf16 %v521_v15, %v520_v14  ;;  %v1648_v22 = vld [vmem:[#allocation7 + $0x28] sm:$0xff]  ;;  %v1647_v23 = vld [vmem:[#allocation7 + $0x20] sm:$0xff]  ;;  %v514_v26 = vld [vmem:[%s2354_s28 + $0x30] sm:$0xff]  ;;  %v525_v33 = vpack.c.bf16 %v511_v25, %v510_v24  ;;  %p2055_p4 = pnand %p2054_p1, %p2311_p7 }
  0x54   : > { %v515_v27 = vld [vmem:[%s2354_s28 + $0x38] sm:$0xff]  ;;  %v518_v28 = vld [vmem:[%s2354_s28 + $0x50] sm:$0xff]  ;;  %v1644_v38 = vld [vmem:[#allocation7 + $0x8] sm:$0xff] }
  0x55   : > { %598 = vmatpush.bf16.msra.mxu0 %v1640_v2  ;;  %1721 = vmatpush.bf16.msra.mxu1 %v1640_v2  ;;  %v519_v29 = vld [vmem:[%s2354_s28 + $0x58] sm:$0xff]  ;;  %v522_v30 = vld [vmem:[%s2354_s28 + $0x70] sm:$0xff]  ;;  %v527_v34 = vpack.c.bf16 %v515_v27, %v514_v26  ;;  %v1643_v39 = vld [vmem:[#allocation7] sm:$0xff]  ;;  %p2056_p8 = pneg %p2055_p4 }
  0x56   : > { %1722 = vmatpush.bf16.msra.mxu2 %v1640_v2  ;;  %1723 = vmatpush.bf16.msra.mxu3 %v1640_v2  ;;  %v523_v31 = vld [vmem:[%s2354_s28 + $0x78] sm:$0xff]  ;;  %v529_v35 = vpack.c.bf16 %v519_v29, %v518_v28  ;;  %v1645_v37 = vld [vmem:[#allocation7 + $0x10] sm:$0xff]  ;;  %v1656_v61 = vld [vmem:[#allocation8 + $0x28] sm:$0xff]  ;;  %s1279_s28 = scalar_lea.sflag [#allocation4], %s2348_s6 }
  0x57   : > { %v1646_v32 = vld [vmem:[#allocation7 + $0x18] sm:$0xff]  ;;  %v531_v36 = vpack.c.bf16 %v523_v31, %v522_v30  ;;  %v1657_v60 = vld [vmem:[#allocation8 + $0x30] sm:$0xff]  ;;  %v1655_v62 = vld [vmem:[#allocation8 + $0x20] sm:$0xff] }
  0x58   : > { %v1658_v55 = vld [vmem:[#allocation8 + $0x38] sm:$0xff]  ;;  %v1653_v2 = vld [vmem:[#allocation8 + $0x10] sm:$0xff]  ;;  %v2407_v9 = vld [vmem:[%s2540_s3] ss:$0 sm:$0xff] }
  0x59   : > { %599 = vmatpush.bf16.msra.mxu0 %v1639_v3  ;;  %1724 = vmatpush.bf16.msra.mxu1 %v1639_v3  ;;  %v1654_v0 = vld [vmem:[#allocation8 + $0x18] sm:$0xff] }
  0x5a   : > { %1725 = vmatpush.bf16.msra.mxu2 %v1639_v3  ;;  %1726 = vmatpush.bf16.msra.mxu3 %v1639_v3 }
  0x5d   : > { %600 = vmatpush.bf16.msra.mxu0 %v1638_v4  ;;  %1727 = vmatpush.bf16.msra.mxu1 %v1638_v4 }
  0x5e   : > { %1728 = vmatpush.bf16.msra.mxu2 %v1638_v4  ;;  %1729 = vmatpush.bf16.msra.mxu3 %v1638_v4  ;;  %v1652_v4 = vld [vmem:[#allocation8 + $0x8] sm:$0xff] }
  0x61   : > { %601 = vmatpush.bf16.msra.mxu0 %v1637_v5  ;;  %1730 = vmatpush.bf16.msra.mxu1 %v1637_v5 }
  0x62   : > { %1731 = vmatpush.bf16.msra.mxu2 %v1637_v5  ;;  %1732 = vmatpush.bf16.msra.mxu3 %v1637_v5  ;;  %v1651_v5 = vld [vmem:[#allocation8] sm:$0xff] }
  0x65   : > { %602 = vmatpush.bf16.msra.mxu0 %v1636_v6  ;;  %1733 = vmatpush.bf16.msra.mxu1 %v1636_v6 }
  0x66   : > { %1734 = vmatpush.bf16.msra.mxu2 %v1636_v6  ;;  %1735 = vmatpush.bf16.msra.mxu3 %v1636_v6 }
  0x69   : > { %603 = vmatpush.bf16.msra.mxu0 %v1635_v7  ;;  %1736 = vmatpush.bf16.msra.mxu1 %v1635_v7 }
  0x6a   : > { %1737 = vmatpush.bf16.msra.mxu2 %v1635_v7  ;;  %1738 = vmatpush.bf16.msra.mxu3 %v1635_v7 }
  0x6c   : > { %604 = vmatmul.bf16.vlgmr.msra.gmra.mxu0 %v524_v17  ;;  %614 = vmatmul.bf16.vlgmr.msra.gmra.mxu1 %v526_v18 }
  0x6d   : > { %721 = vmatpush.bf16.msrb.mxu1 %v1650_v16  ;;  %624 = vmatmul.bf16.vlgmr.msra.gmra.mxu2 %v528_v19 }
  0x6e   : > { %634 = vmatmul.bf16.vlgmr.msra.gmra.mxu3 %v530_v20  ;;  %862 = vmatpush.bf16.msrb.mxu2 %v1658_v55 }
  0x71   : > { %722 = vmatpush.bf16.msrb.mxu1 %v1649_v21 }
  0x72   : > { %863 = vmatpush.bf16.msrb.mxu2 %v1657_v60 }
  0x75   : > { %723 = vmatpush.bf16.msrb.mxu1 %v1648_v22 }
  0x76   : > { %864 = vmatpush.bf16.msrb.mxu2 %v1656_v61 }
  0x79   : > { %724 = vmatpush.bf16.msrb.mxu1 %v1647_v23 }
  0x7a   : > { %865 = vmatpush.bf16.msrb.mxu2 %v1655_v62 }
  0x7c   : > { %609 = vmatmul.bf16.gmra.mxu0 %v525_v33  ;;  %619 = vmatmul.bf16.gmra.mxu1 %v527_v34 }
  0x7d   : > { %725 = vmatpush.bf16.msrb.mxu1 %v1646_v32  ;;  %629 = vmatmul.bf16.gmra.mxu2 %v529_v35 }
  0x7e   : > { %639 = vmatmul.bf16.gmra.mxu3 %v531_v36  ;;  %866 = vmatpush.bf16.msrb.mxu2 %v1654_v0  ;;  %v1661_v0 = vld [vmem:[#allocation10 + $0x10] sm:$0xff] }
  0x81   : > { %726 = vmatpush.bf16.msrb.mxu1 %v1645_v37 }
  0x82   : > { %867 = vmatpush.bf16.msrb.mxu2 %v1653_v2 }
  0x85   : > { %727 = vmatpush.bf16.msrb.mxu1 %v1644_v38 }
  0x86   : > { %868 = vmatpush.bf16.msrb.mxu2 %v1652_v4  ;;  %v1660_v4 = vld [vmem:[#allocation10 + $0x8] sm:$0xff] }
  0x89   : > { %728 = vmatpush.bf16.msrb.mxu1 %v1643_v39 }
  0x8a   : > { %869 = vmatpush.bf16.msrb.mxu2 %v1651_v5 }
  0xe9   : > { %v605_v40 = vpop.f32.mrf.mxu0  ;;  %v615_v45 = vpop.f32.mrf.mxu1 }
  0xf0   : > { %v625_v51 = vpop.f32.mrf.mxu2 }
  0xf1   : > { %v607_v41 = vpop.f32.mrf.mxu0  ;;  %v617_v47 = vpop.f32.mrf.mxu1 }
  0xf2   : > { %v645_v42 = vpack.c.bf16 %v607_v41, %v605_v40  ;;  %v647_v48 = vpack.c.bf16 %v617_v47, %v615_v45  ;;  %v635_v58 = vpop.f32.mrf.mxu3 }
  0xf4   : > { %729 = vmatmul.bf16.vlgmr.msrb.gmra.mxu1 %v645_v42 }
  0xf8   : > { %v627_v53 = vpop.f32.mrf.mxu2 }
  0xf9   : > { %v610_v43 = vpop.f32.mrf.mxu0  ;;  %v620_v49 = vpop.f32.mrf.mxu1  ;;  %v649_v54 = vpack.c.bf16 %v627_v53, %v625_v51  ;;  %v1666_v51 = vld [vmem:[#allocation10 + $0x38] sm:$0xff]  ;;  %v1665_v53 = vld [vmem:[#allocation10 + $0x30] sm:$0xff] }
  0xfa   : > { %v637_v63 = vpop.f32.mrf.mxu3  ;;  %1056 = vmatpush.bf16.msrb.mxu3 %v1666_v51 }
  0xfb   : > { %v651_v1 = vpack.c.bf16 %v637_v63, %v635_v58  ;;  %v1663_v58 = vld [vmem:[#allocation10 + $0x20] sm:$0xff]  ;;  %v1662_v63 = vld [vmem:[#allocation10 + $0x18] sm:$0xff] }
  0xfe   : > { %1057 = vmatpush.bf16.msrb.mxu3 %v1665_v53 }
 0x100   : > { %v630_v56 = vpop.f32.mrf.mxu2 }
 0x101   : > { %v612_v44 = vpop.f32.mrf.mxu0  ;;  %v622_v50 = vpop.f32.mrf.mxu1 }
 0x102   : > { %v646_v46 = vpack.c.bf16 %v612_v44, %v610_v43  ;;  %v648_v52 = vpack.c.bf16 %v622_v50, %v620_v49  ;;  %v640_v3 = vpop.f32.mrf.mxu3 }
 0x104   : > { %734 = vmatmul.bf16.gmra.mxu1 %v646_v46 }
 0x108   : > { %v632_v57 = vpop.f32.mrf.mxu2 }
 0x109   : > { %v650_v59 = vpack.c.bf16 %v632_v57, %v630_v56 }
 0x10a   : > { %v642_v6 = vpop.f32.mrf.mxu3 }
 0x10b   : > { %v652_v7 = vpack.c.bf16 %v642_v6, %v640_v3 }
 0x114   : > { %739 = vmatmul.bf16.gmra.mxu1 %v647_v48 }
 0x124   : > { %744 = vmatmul.bf16.gmra.mxu1 %v648_v52 }
 0x134   : > { %749 = vmatmul.bf16.gmra.mxu1 %v649_v54  ;;  %v1664_v54 = vld [vmem:[#allocation10 + $0x28] sm:$0xff] }
 0x135   : > { %1058 = vmatpush.bf16.msrb.mxu3 %v1664_v54 }
 0x139   : > { %1059 = vmatpush.bf16.msrb.mxu3 %v1663_v58 }
 0x13d   : > { %1060 = vmatpush.bf16.msrb.mxu3 %v1662_v63 }
 0x141   : > { %1061 = vmatpush.bf16.msrb.mxu3 %v1661_v0 }
 0x144   : > { %754 = vmatmul.bf16.gmra.mxu1 %v650_v59 }
 0x145   : > { %1062 = vmatpush.bf16.msrb.mxu3 %v1660_v4 }
 0x154   : > { %759 = vmatmul.bf16.gmra.mxu1 %v651_v1 }
 0x164   : > { %764 = vmatmul.bf16.gmra.mxu1 %v652_v7 }
 0x171   : > { %v730_v8 = vpop.f32.mrf.mxu1 }
 0x172   : > { %v731_v10 = vadd.f32 %v2407_v9, %v730_v8  ;;  %v1659_v8 = vld [vmem:[#allocation10] sm:$0xff] }
 0x173   : > { %1063 = vmatpush.bf16.msrb.mxu3 %v1659_v8  ;;  %v1712_v8 = vld [vmem:[%s2362_s18 + $0x28] sm:$0xff]  }
 0x174   : > { %v770_v13 = vmax.f32 %v731_v10, 0.0 }
 0x179   : > { %v732_v11 = vpop.f32.mrf.mxu1 }
 0x17a   : > { %v733_v12 = vadd.f32 %v2407_v9, %v732_v11  ;;  %v2428_v11 = vld [vmem:[%s2542_s5] ss:$0 sm:$0xff] }
 0x17c   : > { %v771_v14 = vmax.f32 %v733_v12, 0.0 }
 0x17e   : > { %v786_v15 = vpack.c.bf16 %v771_v14, %v770_v13  ;;  %v1677_v13 = vld [vmem:[%s2362_s18] sm:$0xff]  }
 0x180   : > { %870 = vmatmul.bf16.vlgmr.msrb.gmra.mxu2 %v786_v15  ;;  %v1678_v15 = vunpack.c.l.bf16 %v1677_v13 }
 0x181   : > { %v735_v16 = vpop.f32.mrf.mxu1 }
 0x182   : > { %v736_v17 = vadd.f32 %v2407_v9, %v735_v16 }
 0x184   : > { %v772_v20 = vmax.f32 %v736_v17, 0.0  ;;  %v1679_v17 = vunpack.c.h.bf16 %v1677_v13  ;;  %v1698_v13 = vunpack.c.l.bf16 %v1712_v8 }
 0x189   : > { %v737_v18 = vpop.f32.mrf.mxu1 }
 0x18a   : > { %v738_v19 = vadd.f32 %v2407_v9, %v737_v18 }
 0x18c   : > { %v773_v21 = vmax.f32 %v738_v19, 0.0 }
 0x18e   : > { %v787_v22 = vpack.c.bf16 %v773_v21, %v772_v20 }
 0x190   : > { %875 = vmatmul.bf16.gmra.mxu2 %v787_v22 }
 0x191   : > { %v740_v23 = vpop.f32.mrf.mxu1 }
 0x192   : > { %v741_v24 = vadd.f32 %v2407_v9, %v740_v23 }
 0x194   : > { %v774_v27 = vmax.f32 %v741_v24, 0.0  ;;  %v1708_v24 = vld [vmem:[%s2362_s18 + $0x8] sm:$0xff]  }
 0x199   : > { %v742_v25 = vpop.f32.mrf.mxu1 }
 0x19a   : > { %v743_v26 = vadd.f32 %v2407_v9, %v742_v25 }
 0x19c   : > { %v775_v28 = vmax.f32 %v743_v26, 0.0 }
 0x19e   : > { %v788_v29 = vpack.c.bf16 %v775_v28, %v774_v27  ;;  %v1682_v27 = vunpack.c.l.bf16 %v1708_v24 }
 0x1a0   : > { %880 = vmatmul.bf16.gmra.mxu2 %v788_v29  ;;  %v1683_v29 = vunpack.c.h.bf16 %v1708_v24  ;;  %v1672_v24 = vld [vmem:[#allocation11 + $0x28] sm:$0xff] }
 0x1a1   : > { %v745_v30 = vpop.f32.mrf.mxu1 }
 0x1a2   : > { %v746_v31 = vadd.f32 %v2407_v9, %v745_v30 }
 0x1a4   : > { %v776_v34 = vmax.f32 %v746_v31, 0.0 }
 0x1a9   : > { %v747_v32 = vpop.f32.mrf.mxu1 }
 0x1aa   : > { %v748_v33 = vadd.f32 %v2407_v9, %v747_v32 }
 0x1ac   : > { %v777_v35 = vmax.f32 %v748_v33, 0.0 }
 0x1ae   : > { %v789_v36 = vpack.c.bf16 %v777_v35, %v776_v34 }
 0x1b0   : > { %885 = vmatmul.bf16.gmra.mxu2 %v789_v36  ;;  %v1709_v36 = vld [vmem:[%s2362_s18 + $0x10] sm:$0xff]  }
 0x1b1   : > { %v750_v37 = vpop.f32.mrf.mxu1 }
 0x1b2   : > { %v751_v38 = vadd.f32 %v2407_v9, %v750_v37 }
 0x1b4   : > { %v778_v41 = vmax.f32 %v751_v38, 0.0 }
 0x1b9   : > { %v752_v39 = vpop.f32.mrf.mxu1 }
 0x1ba   : > { %v753_v40 = vadd.f32 %v2407_v9, %v752_v39  ;;  %v1686_v39 = vunpack.c.l.bf16 %v1709_v36 }
 0x1bc   : > { %v779_v42 = vmax.f32 %v753_v40, 0.0 }
 0x1be   : > { %v790_v43 = vpack.c.bf16 %v779_v42, %v778_v41  ;;  %v1687_v41 = vunpack.c.h.bf16 %v1709_v36 }
 0x1c0   : > { %890 = vmatmul.bf16.gmra.mxu2 %v790_v43 }
 0x1c1   : > { %v755_v44 = vpop.f32.mrf.mxu1 }
 0x1c2   : > { %v756_v45 = vadd.f32 %v2407_v9, %v755_v44 }
 0x1c4   : > { %v780_v48 = vmax.f32 %v756_v45, 0.0 }
 0x1c9   : > { %v757_v46 = vpop.f32.mrf.mxu1 }
 0x1ca   : > { %v758_v47 = vadd.f32 %v2407_v9, %v757_v46 }
 0x1cc   : > { %v781_v49 = vmax.f32 %v758_v47, 0.0 }
 0x1ce   : > { %v791_v50 = vpack.c.bf16 %v781_v49, %v780_v48  ;;  %v1710_v48 = vld [vmem:[%s2362_s18 + $0x18] sm:$0xff]  }
 0x1cf   : > { %v1690_v51 = vunpack.c.l.bf16 %v1710_v48  ;;  %v1691_v53 = vunpack.c.h.bf16 %v1710_v48 }
 0x1d0   : > { %895 = vmatmul.bf16.gmra.mxu2 %v791_v50 }
 0x1d1   : > { %v760_v52 = vpop.f32.mrf.mxu1 }
 0x1d2   : > { %v761_v55 = vadd.f32 %v2407_v9, %v760_v52 }
 0x1d4   : > { %v782_v59 = vmax.f32 %v761_v55, 0.0 }
 0x1d9   : > { %v762_v56 = vpop.f32.mrf.mxu1 }
 0x1da   : > { %v763_v57 = vadd.f32 %v2407_v9, %v762_v56 }
 0x1dc   : > { %v783_v60 = vmax.f32 %v763_v57, 0.0 }
 0x1de   : > { %v792_v61 = vpack.c.bf16 %v783_v60, %v782_v59  ;;  %v1711_v60 = vld [vmem:[%s2362_s18 + $0x20] sm:$0xff]  }
 0x1df   : > { %v1694_v63 = vunpack.c.l.bf16 %v1711_v60 }
 0x1e0   : > { %900 = vmatmul.bf16.gmra.mxu2 %v792_v61 }
 0x1e1   : > { %v765_v62 = vpop.f32.mrf.mxu1 }
 0x1e2   : > { %v766_v1 = vadd.f32 %v2407_v9, %v765_v62 }
 0x1e4   : > { %v784_v5 = vmax.f32 %v766_v1, 0.0  ;;  %v1695_v1 = vunpack.c.h.bf16 %v1711_v60 }
 0x1e9   : > { %v767_v2 = vpop.f32.mrf.mxu1 }
 0x1ea   : > { %v768_v3 = vadd.f32 %v2407_v9, %v767_v2 }
 0x1ec   : > { %v785_v6 = vmax.f32 %v768_v3, 0.0 }
 0x1ee   : > { %v793_v7 = vpack.c.bf16 %v785_v6, %v784_v5 }
 0x1f0   : > { %905 = vmatmul.bf16.gmra.mxu2 %v793_v7 }
 0x203   : > { %v871_v10 = vpop.f32.mrf.mxu2 }
 0x204   : > { %v872_v12 = vadd.f32 %v2428_v11, %v871_v10 }
 0x206   : > { %v911_v9 = vmax.f32 %v872_v12, 0.0 }
 0x208   : > { %v964_v19 = vadd.f32 %v1678_v15, %v911_v9  ;;  %v1699_v9 = vunpack.c.h.bf16 %v1712_v8 }
 0x20b   : > { %v873_v14 = vpop.f32.mrf.mxu2 }
 0x20c   : > { %v874_v16 = vadd.f32 %v2428_v11, %v873_v14 }
 0x20e   : > { %v912_v18 = vmax.f32 %v874_v16, 0.0 }
 0x210   : > { %v965_v20 = vadd.f32 %v1679_v17, %v912_v18 }
 0x212   : > { %v980_v21 = vpack.c.bf16 %v965_v20, %v964_v19  ;;  %v1674_v20 = vld [vmem:[#allocation11 + $0x38] sm:$0xff] }
 0x213   : > { %v876_v22 = vpop.f32.mrf.mxu2  ;;  %1197 = vmatpush.bf16.msrb.mxu0 %v1674_v20 }
 0x214   : > { %1064 = vmatmul.bf16.vlgmr.msrb.gmra.mxu3 %v980_v21  ;;  %v877_v23 = vadd.f32 %v2428_v11, %v876_v22  ;;  %v1673_v21 = vld [vmem:[#allocation11 + $0x30] sm:$0xff] }
 0x216   : > { %v913_v26 = vmax.f32 %v877_v23, 0.0  ;;  %v1713_v23 = vld [vmem:[%s2362_s18 + $0x30] sm:$0xff]  }
 0x217   : > { %1198 = vmatpush.bf16.msrb.mxu0 %v1673_v21 }
 0x218   : > { %v966_v31 = vadd.f32 %v1682_v27, %v913_v26  ;;  %v1702_v27 = vunpack.c.l.bf16 %v1713_v23 }
 0x21b   : > { %v878_v25 = vpop.f32.mrf.mxu2  ;;  %1199 = vmatpush.bf16.msrb.mxu0 %v1672_v24 }
 0x21c   : > { %v879_v28 = vadd.f32 %v2428_v11, %v878_v25 }
 0x21e   : > { %v914_v30 = vmax.f32 %v879_v28, 0.0 }
 0x220   : > { %v967_v32 = vadd.f32 %v1683_v29, %v914_v30  ;;  %v1703_v29 = vunpack.c.h.bf16 %v1713_v23 }
 0x222   : > { %v981_v33 = vpack.c.bf16 %v967_v32, %v966_v31  ;;  %v1671_v31 = vld [vmem:[#allocation11 + $0x20] sm:$0xff] }
 0x223   : > { %v881_v34 = vpop.f32.mrf.mxu2  ;;  %1200 = vmatpush.bf16.msrb.mxu0 %v1671_v31 }
 0x224   : > { %1069 = vmatmul.bf16.gmra.mxu3 %v981_v33  ;;  %v882_v35 = vadd.f32 %v2428_v11, %v881_v34 }
 0x226   : > { %v915_v38 = vmax.f32 %v882_v35, 0.0  ;;  %v1670_v35 = vld [vmem:[#allocation11 + $0x18] sm:$0xff] }
 0x227   : > { %1201 = vmatpush.bf16.msrb.mxu0 %v1670_v35 }
 0x228   : > { %v968_v43 = vadd.f32 %v1686_v39, %v915_v38  ;;  %v1714_v38 = vld [vmem:[%s2362_s18 + $0x38] sm:$0xff]   ;;  %v1669_v39 = vld [vmem:[#allocation11 + $0x10] sm:$0xff]  ;;  %s2057_s18 = scalar_lea.hbm %s2547_s10, 256 }
 0x229   : > { %p2059_p12 = scmp.lt.s32.totalorder %s2057_s18, %s2053_s16 }
 0x22b   : > { %v883_v37 = vpop.f32.mrf.mxu2  ;;  %1202 = vmatpush.bf16.msrb.mxu0 %v1669_v39  ;;  %p2060_p13 = por %p2059_p12, %p2058_p10 }
 0x22c   : > { %v884_v40 = vadd.f32 %v2428_v11, %v883_v37 }
 0x22d   : > { %p2061_p0 = pnand %p2060_p13, %p2056_p8 }
 0x22e   : > { %v916_v42 = vmax.f32 %v884_v40, 0.0 }
 0x230   : > { %v969_v44 = vadd.f32 %v1687_v41, %v916_v42  ;;  %v1668_v41 = vld [vmem:[#allocation11 + $0x8] sm:$0xff] }
 0x231   : > { %1203 = vmatpush.bf16.msrb.mxu0 %v1668_v41 }
 0x232   : > { %v982_v45 = vpack.c.bf16 %v969_v44, %v968_v43  ;;  %v1706_v43 = vunpack.c.l.bf16 %v1714_v38 }
 0x233   : > { %v886_v46 = vpop.f32.mrf.mxu2 }
 0x234   : > { %1074 = vmatmul.bf16.gmra.mxu3 %v982_v45  ;;  %v887_v47 = vadd.f32 %v2428_v11, %v886_v46  ;;  %v1707_v45 = vunpack.c.h.bf16 %v1714_v38 }
 0x236   : > { %v917_v50 = vmax.f32 %v887_v47, 0.0 }
 0x238   : > { %v970_v55 = vadd.f32 %v1690_v51, %v917_v50 }
 0x23b   : > { %v888_v49 = vpop.f32.mrf.mxu2 }
 0x23c   : > { %v889_v52 = vadd.f32 %v2428_v11, %v888_v49  ;;  %v1667_v49 = vld [vmem:[#allocation11] sm:$0xff] }
 0x23d   : > { %1204 = vmatpush.bf16.msrb.mxu0 %v1667_v49 }
 0x23e   : > { %v918_v54 = vmax.f32 %v889_v52, 0.0  ;;  %v1855_v52 = vld [vmem:[%s2544_s7] ss:$0 sm:$0xff] }
 0x240   : > { %v971_v56 = vadd.f32 %v1691_v53, %v918_v54 }
 0x242   : > { %v983_v57 = vpack.c.bf16 %v971_v56, %v970_v55 }
 0x243   : > { %v891_v58 = vpop.f32.mrf.mxu2 }
 0x244   : > { %1079 = vmatmul.bf16.gmra.mxu3 %v983_v57  ;;  %v892_v59 = vadd.f32 %v2428_v11, %v891_v58 }
 0x246   : > { %v919_v62 = vmax.f32 %v892_v59, 0.0 }
 0x248   : > { %v972_v3 = vadd.f32 %v1694_v63, %v919_v62 }
 0x24b   : > { %v893_v61 = vpop.f32.mrf.mxu2 }
 0x24c   : > { %v894_v0 = vadd.f32 %v2428_v11, %v893_v61 }
 0x24e   : > { %v920_v2 = vmax.f32 %v894_v0, 0.0 }
 0x250   : > { %v973_v4 = vadd.f32 %v1695_v1, %v920_v2 }
 0x252   : > { %v984_v5 = vpack.c.bf16 %v973_v4, %v972_v3 }
 0x253   : > { %v896_v6 = vpop.f32.mrf.mxu2 }
 0x254   : > { %1084 = vmatmul.bf16.gmra.mxu3 %v984_v5  ;;  %v897_v7 = vadd.f32 %v2428_v11, %v896_v6 }
 0x256   : > { %v921_v12 = vmax.f32 %v897_v7, 0.0 }
 0x258   : > { %v974_v16 = vadd.f32 %v1698_v13, %v921_v12 }
 0x25b   : > { %v898_v10 = vpop.f32.mrf.mxu2 }
 0x25c   : > { %v899_v14 = vadd.f32 %v2428_v11, %v898_v10 }
 0x25e   : > { %v922_v15 = vmax.f32 %v899_v14, 0.0 }
 0x260   : > { %v975_v17 = vadd.f32 %v1699_v9, %v922_v15 }
 0x262   : > { %v985_v18 = vpack.c.bf16 %v975_v17, %v974_v16 }
 0x263   : > { %v901_v19 = vpop.f32.mrf.mxu2 }
 0x264   : > { %1089 = vmatmul.bf16.gmra.mxu3 %v985_v18  ;;  %v902_v22 = vadd.f32 %v2428_v11, %v901_v19 }
 0x266   : > { %v923_v26 = vmax.f32 %v902_v22, 0.0 }
 0x268   : > { %v976_v32 = vadd.f32 %v1702_v27, %v923_v26 }
 0x26b   : > { %v903_v25 = vpop.f32.mrf.mxu2 }
 0x26c   : > { %v904_v28 = vadd.f32 %v2428_v11, %v903_v25 }
 0x26e   : > { %v924_v30 = vmax.f32 %v904_v28, 0.0 }
 0x270   : > { %v977_v33 = vadd.f32 %v1703_v29, %v924_v30 }
 0x272   : > { %v986_v34 = vpack.c.bf16 %v977_v33, %v976_v32 }
 0x273   : > { %v906_v36 = vpop.f32.mrf.mxu2 }
 0x274   : > { %1094 = vmatmul.bf16.gmra.mxu3 %v986_v34  ;;  %v907_v37 = vadd.f32 %v2428_v11, %v906_v36 }
 0x276   : > { %v925_v42 = vmax.f32 %v907_v37, 0.0 }
 0x278   : > { %v978_v47 = vadd.f32 %v1706_v43, %v925_v42 }
 0x27b   : > { %v908_v40 = vpop.f32.mrf.mxu2 }
 0x27c   : > { %v909_v44 = vadd.f32 %v2428_v11, %v908_v40 }
 0x27e   : > { %v926_v46 = vmax.f32 %v909_v44, 0.0  ;;  %v2460_v44 = vld [vmem:[%s2546_s9] ss:$0 sm:$0xff] }
 0x280   : > { %v979_v48 = vadd.f32 %v1707_v45, %v926_v46 }
 0x282   : > { %v987_v50 = vpack.c.bf16 %v979_v48, %v978_v47 }
 0x284   : > { %1099 = vmatmul.bf16.gmra.mxu3 %v987_v50 }
 0x297   : > { %v1065_v51 = vpop.f32.mrf.mxu3 }
 0x298   : > { %v1066_v53 = vadd.f32 %v1855_v52, %v1065_v51 }
 0x29a   : > { %v1105_v56 = vmax.f32 %v1066_v53, 0.0 }
 0x29f   : > { %v1067_v54 = vpop.f32.mrf.mxu3 }
 0x2a0   : > { %v1068_v55 = vadd.f32 %v1855_v52, %v1067_v54 }
 0x2a2   : > { %v1106_v57 = vmax.f32 %v1068_v55, 0.0 }
 0x2a4   : > { %v1121_v11 = vpack.c.bf16 %v1106_v57, %v1105_v56 }
 0x2a6   : > { %1205 = vmatmul.bf16.vlgmr.msrb.gmra.mxu0 %v1121_v11 }
 0x2a7   : > { %v1070_v58 = vpop.f32.mrf.mxu3 }
 0x2a8   : > { %v1071_v59 = vadd.f32 %v1855_v52, %v1070_v58 }
 0x2aa   : > { %v1107_v62 = vmax.f32 %v1071_v59, 0.0 }
 0x2af   : > { %v1072_v60 = vpop.f32.mrf.mxu3 }
 0x2b0   : > { %v1073_v61 = vadd.f32 %v1855_v52, %v1072_v60 }
 0x2b2   : > { %v1108_v63 = vmax.f32 %v1073_v61, 0.0 }
 0x2b4   : > { %v1122_v0 = vpack.c.bf16 %v1108_v63, %v1107_v62 }
 0x2b6   : > { %1210 = vmatmul.bf16.gmra.mxu0 %v1122_v0 }
 0x2b7   : > { %v1075_v1 = vpop.f32.mrf.mxu3 }
 0x2b8   : > { %v1076_v2 = vadd.f32 %v1855_v52, %v1075_v1 }
 0x2ba   : > { %v1109_v5 = vmax.f32 %v1076_v2, 0.0 }
 0x2bf   : > { %v1077_v3 = vpop.f32.mrf.mxu3 }
 0x2c0   : > { %v1078_v4 = vadd.f32 %v1855_v52, %v1077_v3 }
 0x2c2   : > { %v1110_v6 = vmax.f32 %v1078_v4, 0.0 }
 0x2c4   : > { %v1123_v7 = vpack.c.bf16 %v1110_v6, %v1109_v5 }
 0x2c6   : > { %1215 = vmatmul.bf16.gmra.mxu0 %v1123_v7 }
 0x2c7   : > { %v1080_v8 = vpop.f32.mrf.mxu3 }
 0x2c8   : > { %v1081_v10 = vadd.f32 %v1855_v52, %v1080_v8 }
 0x2ca   : > { %v1111_v14 = vmax.f32 %v1081_v10, 0.0 }
 0x2cf   : > { %v1082_v12 = vpop.f32.mrf.mxu3 }
 0x2d0   : > { %v1083_v13 = vadd.f32 %v1855_v52, %v1082_v12 }
 0x2d2   : > { %v1112_v9 = vmax.f32 %v1083_v13, 0.0 }
 0x2d4   : > { %v1124_v15 = vpack.c.bf16 %v1112_v9, %v1111_v14 }
 0x2d6   : > { %1220 = vmatmul.bf16.gmra.mxu0 %v1124_v15 }
 0x2d7   : > { %v1085_v16 = vpop.f32.mrf.mxu3 }
 0x2d8   : > { %v1086_v17 = vadd.f32 %v1855_v52, %v1085_v16 }
 0x2da   : > { %v1113_v20 = vmax.f32 %v1086_v17, 0.0 }
 0x2df   : > { %v1087_v18 = vpop.f32.mrf.mxu3 }
 0x2e0   : > { %v1088_v19 = vadd.f32 %v1855_v52, %v1087_v18 }
 0x2e2   : > { %v1114_v21 = vmax.f32 %v1088_v19, 0.0 }
 0x2e4   : > { %v1125_v22 = vpack.c.bf16 %v1114_v21, %v1113_v20 }
 0x2e6   : > { %1225 = vmatmul.bf16.gmra.mxu0 %v1125_v22 }
 0x2e7   : > { %v1090_v23 = vpop.f32.mrf.mxu3 }
 0x2e8   : > { %v1091_v24 = vadd.f32 %v1855_v52, %v1090_v23 }
 0x2ea   : > { %v1115_v27 = vmax.f32 %v1091_v24, 0.0 }
 0x2ef   : > { %v1092_v25 = vpop.f32.mrf.mxu3 }
 0x2f0   : > { %v1093_v26 = vadd.f32 %v1855_v52, %v1092_v25 }
 0x2f2   : > { %v1116_v28 = vmax.f32 %v1093_v26, 0.0 }
 0x2f4   : > { %v1126_v29 = vpack.c.bf16 %v1116_v28, %v1115_v27 }
 0x2f6   : > { %1230 = vmatmul.bf16.gmra.mxu0 %v1126_v29 }
 0x2f7   : > { %v1095_v30 = vpop.f32.mrf.mxu3 }
 0x2f8   : > { %v1096_v31 = vadd.f32 %v1855_v52, %v1095_v30 }
 0x2fa   : > { %v1117_v34 = vmax.f32 %v1096_v31, 0.0 }
 0x2ff   : > { %v1097_v32 = vpop.f32.mrf.mxu3 }
 0x300   : > { %v1098_v33 = vadd.f32 %v1855_v52, %v1097_v32 }
 0x302   : > { %v1118_v35 = vmax.f32 %v1098_v33, 0.0 }
 0x304   : > { %v1127_v36 = vpack.c.bf16 %v1118_v35, %v1117_v34 }
 0x306   : > { %1235 = vmatmul.bf16.gmra.mxu0 %v1127_v36 }
 0x307   : > { %v1100_v37 = vpop.f32.mrf.mxu3 }
 0x308   : > { %v1101_v38 = vadd.f32 %v1855_v52, %v1100_v37 }
 0x30a   : > { %v1119_v41 = vmax.f32 %v1101_v38, 0.0 }
 0x30f   : > { %v1102_v39 = vpop.f32.mrf.mxu3 }
 0x310   : > { %v1103_v40 = vadd.f32 %v1855_v52, %v1102_v39 }
 0x312   : > { %v1120_v42 = vmax.f32 %v1103_v40, 0.0 }
 0x314   : > { %v1128_v43 = vpack.c.bf16 %v1120_v42, %v1119_v41 }
 0x316   : > { %1240 = vmatmul.bf16.gmra.mxu0 %v1128_v43 }
 0x323   : > { %v1206_v45 = vpop.f32.mrf.mxu0 }
 0x324   : > { %v1207_v46 = vadd.f32 %v2460_v44, %v1206_v45 }
 0x326   : > { %v1246_v47 = vmax.f32 %v1207_v46, 0.0 }
 0x328   : > { %1262 = vst [vmem:[%s2465_s20] sm:$0xff] %v1246_v47 }
 0x32b   : > { %v1208_v48 = vpop.f32.mrf.mxu0 }
 0x32c   : > { %v1209_v49 = vadd.f32 %v2460_v44, %v1208_v48 }
 0x32e   : > { %v1247_v50 = vmax.f32 %v1209_v49, 0.0 }
 0x330   : > { %1263 = vst [vmem:[%s2465_s20 + $0x8] sm:$0xff] %v1247_v50 }
 0x333   : > { %v1211_v51 = vpop.f32.mrf.mxu0 }
 0x334   : > { %v1212_v52 = vadd.f32 %v2460_v44, %v1211_v51 }
 0x336   : > { %v1248_v53 = vmax.f32 %v1212_v52, 0.0 }
 0x338   : > { %1264 = vst [vmem:[%s2465_s20 + $0x10] sm:$0xff] %v1248_v53 }
 0x33b   : > { %v1213_v54 = vpop.f32.mrf.mxu0 }
 0x33c   : > { %v1214_v55 = vadd.f32 %v2460_v44, %v1213_v54 }
 0x33e   : > { %v1249_v56 = vmax.f32 %v1214_v55, 0.0 }
 0x340   : > { %1265 = vst [vmem:[%s2465_s20 + $0x18] sm:$0xff] %v1249_v56 }
 0x343   : > { %v1216_v57 = vpop.f32.mrf.mxu0 }
 0x344   : > { %v1217_v11 = vadd.f32 %v2460_v44, %v1216_v57 }
 0x346   : > { %v1250_v58 = vmax.f32 %v1217_v11, 0.0 }
 0x348   : > { %1266 = vst [vmem:[%s2465_s20 + $0x20] sm:$0xff] %v1250_v58 }
 0x34b   : > { %v1218_v59 = vpop.f32.mrf.mxu0 }
 0x34c   : > { %v1219_v60 = vadd.f32 %v2460_v44, %v1218_v59 }
 0x34e   : > { %v1251_v61 = vmax.f32 %v1219_v60, 0.0 }
 0x350   : > { %1267 = vst [vmem:[%s2465_s20 + $0x28] sm:$0xff] %v1251_v61 }
 0x353   : > { %v1221_v62 = vpop.f32.mrf.mxu0 }
 0x354   : > { %v1222_v63 = vadd.f32 %v2460_v44, %v1221_v62 }
 0x356   : > { %v1252_v0 = vmax.f32 %v1222_v63, 0.0 }
 0x358   : > { %1268 = vst [vmem:[%s2465_s20 + $0x30] sm:$0xff] %v1252_v0 }
 0x35b   : > { %v1223_v1 = vpop.f32.mrf.mxu0 }
 0x35c   : > { %v1224_v2 = vadd.f32 %v2460_v44, %v1223_v1 }
 0x35e   : > { %v1253_v3 = vmax.f32 %v1224_v2, 0.0 }
 0x360   : > { %1269 = vst [vmem:[%s2465_s20 + $0x38] sm:$0xff] %v1253_v3 }
 0x363   : > { %v1226_v4 = vpop.f32.mrf.mxu0 }
 0x364   : > { %v1227_v5 = vadd.f32 %v2460_v44, %v1226_v4 }
 0x366   : > { %v1254_v6 = vmax.f32 %v1227_v5, 0.0 }
 0x368   : > { %1270 = vst [vmem:[%s2465_s20 + $0x40] sm:$0xff] %v1254_v6 }
 0x36b   : > { %v1228_v7 = vpop.f32.mrf.mxu0 }
 0x36c   : > { %v1229_v8 = vadd.f32 %v2460_v44, %v1228_v7 }
 0x36e   : > { %v1255_v10 = vmax.f32 %v1229_v8, 0.0 }
 0x370   : > { %1271 = vst [vmem:[%s2465_s20 + $0x48] sm:$0xff] %v1255_v10 }
 0x373   : > { %v1231_v12 = vpop.f32.mrf.mxu0 }
 0x374   : > { %v1232_v13 = vadd.f32 %v2460_v44, %v1231_v12 }
 0x376   : > { %v1256_v14 = vmax.f32 %v1232_v13, 0.0 }
 0x378   : > { %1272 = vst [vmem:[%s2465_s20 + $0x50] sm:$0xff] %v1256_v14 }
 0x37b   : > { %v1233_v9 = vpop.f32.mrf.mxu0 }
 0x37c   : > { %v1234_v15 = vadd.f32 %v2460_v44, %v1233_v9 }
 0x37e   : > { %v1257_v16 = vmax.f32 %v1234_v15, 0.0 }
 0x380   : > { %1273 = vst [vmem:[%s2465_s20 + $0x58] sm:$0xff] %v1257_v16 }
 0x383   : > { %v1236_v17 = vpop.f32.mrf.mxu0 }
 0x384   : > { %v1237_v18 = vadd.f32 %v2460_v44, %v1236_v17 }
 0x386   : > { %v1258_v19 = vmax.f32 %v1237_v18, 0.0 }
 0x388   : > { %1274 = vst [vmem:[%s2465_s20 + $0x60] sm:$0xff] %v1258_v19 }
 0x38b   : > { %v1238_v20 = vpop.f32.mrf.mxu0 }
 0x38c   : > { %v1239_v21 = vadd.f32 %v2460_v44, %v1238_v20 }
 0x38e   : > { %v1259_v22 = vmax.f32 %v1239_v21, 0.0 }
 0x390   : > { %1275 = vst [vmem:[%s2465_s20 + $0x68] sm:$0xff] %v1259_v22 }
 0x393   : > { %v1241_v23 = vpop.f32.mrf.mxu0 }
 0x394   : > { %v1242_v24 = vadd.f32 %v2460_v44, %v1241_v23 }
 0x396   : > { %v1260_v25 = vmax.f32 %v1242_v24, 0.0 }
 0x398   : > { %1276 = vst [vmem:[%s2465_s20 + $0x70] sm:$0xff] %v1260_v25 }
 0x39b   : > { %v1243_v26 = vpop.f32.mrf.mxu0 }
 0x39c   : > { %v1244_v27 = vadd.f32 %v2460_v44, %v1243_v26 }
 0x39e   : > { %v1261_v28 = vmax.f32 %v1244_v27, 0.0 }
 0x3a0   : > { %1277 = vst [vmem:[%s2465_s20 + $0x78] sm:$0xff] %v1261_v28 }
 0x3a1   : > { %2064 = shalt.err (!%p2061_p0)
}
 0x3a2   : > { %s2145_s6 = smov 128   ;;  %s2146_s26 = smov 8  }
 0x3a3   : > { %1759 = dma.vmem_to_hbm [thread:$0]  (%p2311_p7), %s1294_s23, 2048, %s1296_s12, %s1279_s28, %s2145_s6, %s2145_s6, %s2146_s26  }
 0x3a4 PF: > { %s2585_s29 = sld [smem:[#allocation20_spill]]  ;;  %p1782_p3 = pnand %p1453_p11, %p2247_p6 }
 0x3a5   : > { %s2587_s25 = sld [smem:[#allocation22_spill]] }
 0x3a6   : > { %p1783_p5 = pneg %p1782_p3 }
 0x3aa   : > { %s1310_s27 = sand.u32 1, %s2585_s29  }
 0x3ab   : > { %s1311_s11 = scalar_lea.sflag [#allocation4], %s1310_s27 }
 0x3ac   : > { %2110 = dma.done.wait (%p1783_p5), %s1311_s11, 2048  }
 0x3ad   : > { %2112 = vsyncadd (%p1783_p5), %s1311_s11, 4294965248  ;;  %s31_s18 = sadd.s32 1, %s2587_s25   ;;  %s2588_s20 = sld [smem:[#allocation21_spill]] }
 0x3ae   : > { %p28_p9 = scmp.ge.s32.totalorder %s31_s18, 4   ;;  %s2589_s15 = sld [smem:[#allocation26_spill]] }
 0x3af   : > { %s2590_s30 = sld [smem:[#allocation24_spill]]  ;;  %s2591_s13 = smov %s2119_s14 }
 0x3b0   : > { %s2593_s16 = smov %s2131_s17 }
 0x3b1   :  { %30 = sbr.rel (!%p28_p9) target bundleno = 16 (0x10), region = 135 }
 0x3b3   : > { %s2592_s14 = smov %s2588_s20 }
 0x3b5   : > { %s2594_s17 = smov %s2590_s30 }
 0x3b6   :  { %1317 = vsyncpa [#allocation3], 1 }
 0x3b7   :  { %1319 = vsyncpa [#allocation3 + $0x1], 1 }
 0x3b8   :  { %1320 = vsyncpa [#allocation6], 1 }
 0x3b9   :  { %1322 = vsyncpa [#allocation6 + $0x1], 1 }
 0x3ba   :  { %1323 = vsyncpa [#allocation9], 1 }
 0x3bb   :  { %1324 = vsyncpa [#allocation12], 1 }
 0x3bc   :  { %1325 = vsyncpa [#allocation4], 1 }
 0x3bd   :  { %1327 = vsyncpa [#allocation4 + $0x1], 1 }

</bundles_post_ra>
